<compile_context>
chip_gen: v7x
topology: tpu7x:2x2x1
jax: 0.10.0
libtpu: 0.0.40
codegen_flags: <defaults>
</compile_context>

<pallas_src>
import functools

import jax
import jax.numpy as jnp
import numpy as np
from jax.experimental import pallas as pl
from jax.experimental.pallas import tpu as pltpu

EPS = 1e-5
CIN_PAD = 8  # xyz channels zero-padded 3 -> 8 for denser per-step DMA rows.


# -----------------------------------------------------------------------------
# Kernel: per-point MLP (three 1x1 convs; input transform + BN scales folded
# into the weights) + shift/ReLU for layers 1-2 + running max over the point
# axis accumulated directly in the resident output block.
# Grid = (B, P, N // (P*TN)); B and the point-shard axis P are "parallel"
# (megacore), the inner point axis is the reduction axis ("arbitrary", last).
# -----------------------------------------------------------------------------
def _encoder_kernel(x_ref, w1_ref, w2_ref, w3_ref, sh1_ref, sh2_ref, out_ref,
                    *, col_chunk):
    n = pl.program_id(2)

    x = x_ref[0]                                                    # (TN, Cin_pad) bf16
    # layer 1: conv1 (input transform + BN scale folded into w1) + shift + ReLU
    h = jnp.dot(x, w1_ref[0], preferred_element_type=jnp.float32)  # (TN, 64) f32
    h = jnp.maximum(h + sh1_ref[...], 0.0).astype(jnp.bfloat16)
    # layer 2: conv2 (BN scale folded) + shift + ReLU
    h = jnp.dot(h, w2_ref[...], preferred_element_type=jnp.float32)  # (TN, 128) f32
    h = jnp.maximum(h + sh2_ref[...], 0.0).astype(jnp.bfloat16)

    # layer 3: conv3 (BN scale folded); shift + optional ReLU are deferred to
    # after the global max in the wrapper (exact algebra).  Output columns are
    # processed in col_chunk slabs so the live f32 activation is (TN, col_chunk)
    # instead of (TN, 1024).
    c3 = w3_ref.shape[1]
    tile_max = []
    for c in range(0, c3, col_chunk):                               # static unroll
        hc = jnp.dot(h, w3_ref[:, c:c + col_chunk],
                     preferred_element_type=jnp.float32)            # (TN, chunk) f32
        tile_max.append(jnp.max(hc, axis=0, keepdims=True))         # (1, chunk)
    tile_max = jnp.concatenate(tile_max, axis=-1)                   # (1, C3) f32

    # torch.max(x, 2)[0]: running max over point tiles, accumulated in-place in
    # the output block (its index is constant over the arbitrary n axis).
    @pl.when(n == 0)
    def _init():
        out_ref[0] = tile_max

    @pl.when(n > 0)
    def _update():
        out_ref[0] = jnp.maximum(out_ref[0], tile_max)


def pointnet_encoder(x_pad, w1_b, w2, w3, sh1, sh2, *, point_tile,
                     point_shards=1, col_chunk=256):
    """x_pad: (B,N,Cin_pad) bf16; w1_b: (1|B,Cin_pad,C1) bf16 (input transform +
    BN scale pre-folded); w2,w3: bf16 (BN scale pre-folded); sh1,sh2: (1,C) f32
    shifts.  Returns the raw channel max (B, C3) f32 (layer-3 shift/ReLU are the
    caller's job)."""
    B, N, Cin = x_pad.shape
    Bw, _, C1 = w1_b.shape
    C2, C3 = w2.shape[1], w3.shape[1]

    tn = min(point_tile, N)
    P = point_shards
    # TODO(synk): pad the point axis with rows that cannot win the max when N
    # does not tile cleanly; for now require clean tiling.
    assert N % (P * tn) == 0 and tn % 8 == 0, "point axis must tile cleanly"
    nt = N // (P * tn)
    assert C3 % col_chunk == 0 and col_chunk % 128 == 0

    # shared w1 (STN trunk, trans = I) vs per-batch fused w1 (backbone)
    w1_map = (lambda b, p, n: (0, 0, 0)) if Bw == 1 else (lambda b, p, n: (b, 0, 0))

    kernel = functools.partial(_encoder_kernel, col_chunk=col_chunk)
    out = pl.pallas_call(
        kernel,
        out_shape=jax.ShapeDtypeStruct((B, 1, P * C3), jnp.float32),
        grid=(B, P, nt),
        in_specs=[
            pl.BlockSpec((1, tn, Cin), lambda b, p, n: (b, p * nt + n, 0)),
            pl.BlockSpec((1, Cin, C1), w1_map),
            pl.BlockSpec((C1, C2), lambda b, p, n: (0, 0)),
            pl.BlockSpec((C2, C3), lambda b, p, n: (0, 0)),
            pl.BlockSpec((1, C1), lambda b, p, n: (0, 0)),
            pl.BlockSpec((1, C2), lambda b, p, n: (0, 0)),
        ],
        out_specs=pl.BlockSpec((1, 1, C3), lambda b, p, n: (b, 0, p)),
        compiler_params=pltpu.CompilerParams(
            dimension_semantics=("parallel", "parallel", "arbitrary"),
            vmem_limit_bytes=32 * 1024 * 1024),
    )(x_pad, w1_b, w2, w3, sh1, sh2)
    # combine per-shard partial maxes (no-op when P == 1)
    return jnp.max(out.reshape(B, P, C3), axis=1)                   # (B, C3)


# -----------------------------------------------------------------------------
# STN3d regression head: (B,1024)->512->256->9 (+identity).  M = B rows, so the
# MXU would be nearly idle; per the perf review this stays plain XLA.
# -----------------------------------------------------------------------------
def _stn_head(g, p):
    h = jnp.maximum(g @ p["stnf1_w"] * p["stnf1_ss"][0] + p["stnf1_ss"][1], 0.0)
    h = jnp.maximum(h @ p["stnf2_w"] * p["stnf2_ss"][0] + p["stnf2_ss"][1], 0.0)
    t9 = h @ p["stnf3_w"] + p["stnf3_b"] + jnp.eye(3, dtype=jnp.float32).reshape(1, 9)
    return t9.reshape(-1, 3, 3)


# -----------------------------------------------------------------------------
# Weight / input preparation shared by the Pallas path and the pure-JAX ref.
# -----------------------------------------------------------------------------
def _prep_points(x_bcn, cin_pad=CIN_PAD):
    B, C, N = x_bcn.shape
    x = jnp.transpose(x_bcn, (0, 2, 1)).astype(jnp.bfloat16)        # (B, N, C)
    return jnp.pad(x, ((0, 0), (0, 0), (0, cin_pad - C)))           # (B, N, cin_pad)


def _prep_w1(w1_b, ss, cin_pad=CIN_PAD):
    # w1_b: (Bw, Cin, C1) f32.  Fold the BN scale into the output columns in
    # f32, zero-pad the input-channel rows, then cast to bf16.
    w = w1_b * ss[0]
    w = jnp.pad(w, ((0, 0), (0, cin_pad - w.shape[1]), (0, 0)))
    return w.astype(jnp.bfloat16)


def _prep_w(w, ss):
    # Fold the BN scale into the output columns (f32) before the bf16 cast.
    return (w * ss[0]).astype(jnp.bfloat16)


# -----------------------------------------------------------------------------
# Parameter setup (deterministic, synthetic).
# -----------------------------------------------------------------------------
def _fuse_bias_bn(bias, gamma, beta, mean, var):
    scale = gamma / jnp.sqrt(var + EPS)
    shift = beta + (bias - mean) * scale
    return jnp.stack([scale, shift]).astype(jnp.float32)            # (2, C)


def init_params(key):
    ks = iter(jax.random.split(key, 64))

    def lin(cin, cout):
        w = jax.random.normal(next(ks), (cin, cout), jnp.float32) / np.sqrt(cin)
        b = 0.05 * jax.random.normal(next(ks), (cout,), jnp.float32)
        return w, b

    def bn(c):
        gamma = 1.0 + 0.1 * jax.random.normal(next(ks), (c,), jnp.float32)
        beta = 0.1 * jax.random.normal(next(ks), (c,), jnp.float32)
        return gamma, beta, jnp.zeros((c,), jnp.float32), jnp.ones((c,), jnp.float32)

    p = {}
    # STN3d trunk: conv1(3->64), conv2(64->128), conv3(128->1024) + bn1..3
    for name, cin, cout in [("stn1", 3, 64), ("stn2", 64, 128), ("stn3", 128, 1024)]:
        w, b = lin(cin, cout)
        p[f"{name}_w"], p[f"{name}_ss"] = w, _fuse_bias_bn(b, *bn(cout))
    # STN3d head: fc1(1024->512)+bn4, fc2(512->256)+bn5, fc3(256->9)
    w, b = lin(1024, 512); p["stnf1_w"], p["stnf1_ss"] = w, _fuse_bias_bn(b, *bn(512))
    w, b = lin(512, 256);  p["stnf2_w"], p["stnf2_ss"] = w, _fuse_bias_bn(b, *bn(256))
    w, b = lin(256, 9);    p["stnf3_w"], p["stnf3_b"] = w, b.reshape(1, 9)
    # backbone: conv1(3->64), conv2(64->128), conv3(128->1024) + bn1..3
    for name, cin, cout in [("bb1", 3, 64), ("bb2", 64, 128), ("bb3", 128, 1024)]:
        w, b = lin(cin, cout)
        p[f"{name}_w"], p[f"{name}_ss"] = w, _fuse_bias_bn(b, *bn(cout))
    return p


# -----------------------------------------------------------------------------
# PointNetfeat forward (global_feat=True, feature_transform=False).
# -----------------------------------------------------------------------------
def pointnetfeat_forward(x_bcn, p, *, point_tile=512, point_shards=None):
    B, C, N = x_bcn.shape
    tn = min(point_tile, N)
    if point_shards is None:
        # v7x has 2 TensorCores: guarantee >=2 units of "parallel" grid work even
        # for single-batch inference.  Harmless on v5e/v6e (single TC).
        point_shards = 2 if (B == 1 and N % (2 * tn) == 0) else 1

    # One channels-last, zero-padded bf16 copy of the points, reused by both calls.
    x_pad = _prep_points(x_bcn)                                      # (B, N, 8) bf16

    # ---- STN3d trunk (input transform = identity -> conv1 weight passes through) ----
    g_raw = pointnet_encoder(
        x_pad,
        _prep_w1(p["stn1_w"][None], p["stn1_ss"]),
        _prep_w(p["stn2_w"], p["stn2_ss"]), _prep_w(p["stn3_w"], p["stn3_ss"]),
        p["stn1_ss"][1][None, :], p["stn2_ss"][1][None, :],
        point_tile=tn, point_shards=point_shards)                    # (B, 1024)
    # deferred layer-3 BN shift + ReLU (exact: shift per-channel, ReLU monotone)
    g = jnp.maximum(g_raw + p["stn3_ss"][1], 0.0)

    trans = _stn_head(g, p)                                          # (B, 3, 3)

    # ---- backbone: fuse bmm(x^T, trans) into conv1:  x @ (trans @ w1) ----
    bb_w1 = jnp.einsum("bij,jk->bik", trans, p["bb1_w"])             # (B, 3, 64) f32
    feat_raw = pointnet_encoder(
        x_pad,
        _prep_w1(bb_w1, p["bb1_ss"]),
        _prep_w(p["bb2_w"], p["bb2_ss"]), _prep_w(p["bb3_w"], p["bb3_ss"]),
        p["bb1_ss"][1][None, :], p["bb2_ss"][1][None, :],
        point_tile=tn, point_shards=point_shards)                    # (B, 1024)
    feat = feat_raw + p["bb3_ss"][1]        # deferred BN shift (no ReLU on backbone)
    return feat, trans, None


# -----------------------------------------------------------------------------
# Pure-JAX reference: same prepared (scale-folded, padded, bf16) weights but the
# original op order (shift/ReLU before the max), so it checks both the kernel
# plumbing and the defer-shift/ReLU-past-max rewrite.
# -----------------------------------------------------------------------------
def _ref_encoder(x_pad, w1_b, w2s, w3s, sh1, sh2, sh3, last_relu):
    h = jnp.einsum("bnc,bcd->bnd", x_pad, w1_b, preferred_element_type=jnp.float32)
    h = jnp.maximum(h + sh1, 0.0).astype(jnp.bfloat16)
    h = jnp.einsum("bnc,cd->bnd", h, w2s, preferred_element_type=jnp.float32)
    h = jnp.maximum(h + sh2, 0.0).astype(jnp.bfloat16)
    h = jnp.einsum("bnc,cd->bnd", h, w3s, preferred_element_type=jnp.float32)
    h = h + sh3
    if last_relu:
        h = jnp.maximum(h, 0.0)
    return jnp.max(h, axis=1)


def _ref_forward(x_bcn, p):
    B = x_bcn.shape[0]
    x_pad = _prep_points(x_bcn)
    w1_stn = jnp.broadcast_to(_prep_w1(p["stn1_w"][None], p["stn1_ss"]),
                              (B, CIN_PAD, 64))
    g = _ref_encoder(x_pad, w1_stn,
                     _prep_w(p["stn2_w"], p["stn2_ss"]),
                     _prep_w(p["stn3_w"], p["stn3_ss"]),
                     p["stn1_ss"][1], p["stn2_ss"][1], p["stn3_ss"][1], True)
    trans = _stn_head(g, p)
    bb_w1 = _prep_w1(jnp.einsum("bij,jk->bik", trans, p["bb1_w"]), p["bb1_ss"])
    feat = _ref_encoder(x_pad, bb_w1,
                        _prep_w(p["bb2_w"], p["bb2_ss"]),
                        _prep_w(p["bb3_w"], p["bb3_ss"]),
                        p["bb1_ss"][1], p["bb2_ss"][1], p["bb3_ss"][1], False)
    return feat, trans


if __name__ == "__main__":
    key = jax.random.PRNGKey(0)
    k_x, k_p = jax.random.split(key)

    B, C, N = 2, 3, 256                     # (batch, xyz channels, points)
    x = jax.random.normal(k_x, (B, C, N), jnp.float32)
    params = init_params(k_p)

    # Small point tile for the demo so the running-max accumulator is exercised
    # across multiple grid steps (production default is 512; sweep 512-1024, cap
    # ~1024 on v7x's 64 MiB VMEM).
    fwd = jax.jit(functools.partial(pointnetfeat_forward, point_tile=128))
    feat, trans, trans_feat = fwd(x, params)
    jax.block_until_ready((feat, trans))

    assert feat.shape == (B, 1024) and trans.shape == (B, 3, 3)
    assert trans_feat is None

    ref_feat, ref_trans = _ref_forward(x, params)
    np.testing.assert_allclose(np.asarray(trans), np.asarray(ref_trans),
                               rtol=2e-2, atol=2e-2)
    np.testing.assert_allclose(np.asarray(feat), np.asarray(ref_feat),
                               rtol=2e-2, atol=2e-2)

    # Also exercise the B=1 path, which auto-enables 2 parallel point shards
    # (keeps both v7x TensorCores busy; harmless elsewhere).
    x1 = x[:1]
    feat1, trans1, _ = fwd(x1, params)
    jax.block_until_ready((feat1, trans1))
    ref_feat1, ref_trans1 = _ref_forward(x1, params)
    np.testing.assert_allclose(np.asarray(trans1), np.asarray(ref_trans1),
                               rtol=2e-2, atol=2e-2)
    np.testing.assert_allclose(np.asarray(feat1), np.asarray(ref_feat1),
                               rtol=2e-2, atol=2e-2)

    print("KERNEL_OK")
</pallas_src>

<mosaic_0001>
module attributes {stable_mosaic.version = 11 : i64} {
  func.func @_encoder_kernel(%arg0: i32, %arg1: i32, %arg2: i32, %arg3: memref<1x128x8xbf16, #tpu.memory_space<vmem>>, %arg4: memref<1x8x64xbf16, #tpu.memory_space<vmem>>, %arg5: memref<64x128xbf16, #tpu.memory_space<vmem>>, %arg6: memref<128x1024xbf16, #tpu.memory_space<vmem>>, %arg7: memref<1x64xf32, #tpu.memory_space<vmem>>, %arg8: memref<1x128xf32, #tpu.memory_space<vmem>>, %arg9: memref<1x1x1024xf32, #tpu.memory_space<vmem>>) attributes {dimension_semantics = [#tpu.dimension_semantics<parallel>, #tpu.dimension_semantics<parallel>, #tpu.dimension_semantics<arbitrary>], iteration_bounds = array<i64: 2, 1, 2>, scalar_prefetch = 0 : i64, scratch_operands = 0 : i64, tpu.core_type = #tpu.core_type<tc>, window_params = [{transform_indices = @transform_0, window_bounds = array<i64: 1, 128, 8>}, {pipeline_mode = #tpu.pipeline_mode<synchronous>, transform_indices = @transform_1, window_bounds = array<i64: 1, 8, 64>}, {pipeline_mode = #tpu.pipeline_mode<synchronous>, transform_indices = @transform_2, window_bounds = array<i64: 64, 128>}, {pipeline_mode = #tpu.pipeline_mode<synchronous>, transform_indices = @transform_3, window_bounds = array<i64: 128, 1024>}, {pipeline_mode = #tpu.pipeline_mode<synchronous>, transform_indices = @transform_4, window_bounds = array<i64: 1, 64>}, {pipeline_mode = #tpu.pipeline_mode<synchronous>, transform_indices = @transform_5, window_bounds = array<i64: 1, 128>}, {transform_indices = @transform_6, window_bounds = array<i64: 1, 1, 1024>}]} {
    %c0 = arith.constant 0 : index
    %c0_0 = arith.constant 0 : index
    %c0_1 = arith.constant 0 : index
    %0 = vector.load %arg3[%c0, %c0_0, %c0_1] : memref<1x128x8xbf16, #tpu.memory_space<vmem>>, vector<1x128x8xbf16>
    %1 = vector.shape_cast %0 : vector<1x128x8xbf16> to vector<128x8xbf16>
    %c0_2 = arith.constant 0 : index
    %c0_3 = arith.constant 0 : index
    %c0_4 = arith.constant 0 : index
    %2 = vector.load %arg4[%c0_2, %c0_3, %c0_4] : memref<1x8x64xbf16, #tpu.memory_space<vmem>>, vector<1x8x64xbf16>
    %3 = vector.shape_cast %2 : vector<1x8x64xbf16> to vector<8x64xbf16>
    %cst = arith.constant dense<0.000000e+00> : vector<128x64xf32>
    %4 = tpu.matmul %1, %3, %cst {dimension_numbers = #tpu.dot_dimension_numbers<[1], [0], [0], [1], [0, 0, 1, 1], [], []>} : vector<128x8xbf16>, vector<8x64xbf16>, vector<128x64xf32> -> vector<128x64xf32>
    %c0_5 = arith.constant 0 : index
    %c0_6 = arith.constant 0 : index
    %5 = vector.load %arg7[%c0_5, %c0_6] : memref<1x64xf32, #tpu.memory_space<vmem>>, vector<1x64xf32>
    %6 = vector.broadcast %5 : vector<1x64xf32> to vector<128x64xf32>
    %7 = arith.addf %4, %6 : vector<128x64xf32>
    %cst_7 = arith.constant 0.000000e+00 : f32
    %8 = vector.broadcast %cst_7 : f32 to vector<128x64xf32>
    %9 = arith.maximumf %7, %8 : vector<128x64xf32>
    %10 = arith.truncf %9 : vector<128x64xf32> to vector<128x64xbf16>
    %c0_8 = arith.constant 0 : index
    %c0_9 = arith.constant 0 : index
    %11 = vector.load %arg5[%c0_8, %c0_9] : memref<64x128xbf16, #tpu.memory_space<vmem>>, vector<64x128xbf16>
    %cst_10 = arith.constant dense<0.000000e+00> : vector<128x128xf32>
    %12 = tpu.matmul %10, %11, %cst_10 {dimension_numbers = #tpu.dot_dimension_numbers<[1], [0], [0], [1], [0, 0, 1, 1], [], []>} : vector<128x64xbf16>, vector<64x128xbf16>, vector<128x128xf32> -> vector<128x128xf32>
    %c0_11 = arith.constant 0 : index
    %c0_12 = arith.constant 0 : index
    %13 = vector.load %arg8[%c0_11, %c0_12] : memref<1x128xf32, #tpu.memory_space<vmem>>, vector<1x128xf32>
    %14 = vector.broadcast %13 : vector<1x128xf32> to vector<128x128xf32>
    %15 = arith.addf %12, %14 : vector<128x128xf32>
    %cst_13 = arith.constant 0.000000e+00 : f32
    %16 = vector.broadcast %cst_13 : f32 to vector<128x128xf32>
    %17 = arith.maximumf %15, %16 : vector<128x128xf32>
    %18 = arith.truncf %17 : vector<128x128xf32> to vector<128x128xbf16>
    %c0_14 = arith.constant 0 : index
    %c0_15 = arith.constant 0 : index
    %19 = vector.load %arg6[%c0_14, %c0_15] : memref<128x1024xbf16, #tpu.memory_space<vmem>>, vector<128x256xbf16>
    %cst_16 = arith.constant dense<0.000000e+00> : vector<128x256xf32>
    %20 = tpu.matmul %18, %19, %cst_16 {dimension_numbers = #tpu.dot_dimension_numbers<[1], [0], [0], [1], [0, 0, 1, 1], [], []>} : vector<128x128xbf16>, vector<128x256xbf16>, vector<128x256xf32> -> vector<128x256xf32>
    %cst_17 = arith.constant dense<0xFF800000> : vector<256xf32>
    %21 = vector.multi_reduction <maximumf>, %20, %cst_17 [0] : vector<128x256xf32> to vector<256xf32>
    %22 = vector.shape_cast %21 : vector<256xf32> to vector<1x256xf32>
    %c0_18 = arith.constant 0 : index
    %c256 = arith.constant 256 : index
    %23 = vector.load %arg6[%c0_18, %c256] : memref<128x1024xbf16, #tpu.memory_space<vmem>>, vector<128x256xbf16>
    %cst_19 = arith.constant dense<0.000000e+00> : vector<128x256xf32>
    %24 = tpu.matmul %18, %23, %cst_19 {dimension_numbers = #tpu.dot_dimension_numbers<[1], [0], [0], [1], [0, 0, 1, 1], [], []>} : vector<128x128xbf16>, vector<128x256xbf16>, vector<128x256xf32> -> vector<128x256xf32>
    %cst_20 = arith.constant dense<0xFF800000> : vector<256xf32>
    %25 = vector.multi_reduction <maximumf>, %24, %cst_20 [0] : vector<128x256xf32> to vector<256xf32>
    %26 = vector.shape_cast %25 : vector<256xf32> to vector<1x256xf32>
    %c0_21 = arith.constant 0 : index
    %c512 = arith.constant 512 : index
    %27 = vector.load %arg6[%c0_21, %c512] : memref<128x1024xbf16, #tpu.memory_space<vmem>>, vector<128x256xbf16>
    %cst_22 = arith.constant dense<0.000000e+00> : vector<128x256xf32>
    %28 = tpu.matmul %18, %27, %cst_22 {dimension_numbers = #tpu.dot_dimension_numbers<[1], [0], [0], [1], [0, 0, 1, 1], [], []>} : vector<128x128xbf16>, vector<128x256xbf16>, vector<128x256xf32> -> vector<128x256xf32>
    %cst_23 = arith.constant dense<0xFF800000> : vector<256xf32>
    %29 = vector.multi_reduction <maximumf>, %28, %cst_23 [0] : vector<128x256xf32> to vector<256xf32>
    %30 = vector.shape_cast %29 : vector<256xf32> to vector<1x256xf32>
    %c0_24 = arith.constant 0 : index
    %c768 = arith.constant 768 : index
    %31 = vector.load %arg6[%c0_24, %c768] : memref<128x1024xbf16, #tpu.memory_space<vmem>>, vector<128x256xbf16>
    %cst_25 = arith.constant dense<0.000000e+00> : vector<128x256xf32>
    %32 = tpu.matmul %18, %31, %cst_25 {dimension_numbers = #tpu.dot_dimension_numbers<[1], [0], [0], [1], [0, 0, 1, 1], [], []>} : vector<128x128xbf16>, vector<128x256xbf16>, vector<128x256xf32> -> vector<128x256xf32>
    %cst_26 = arith.constant dense<0xFF800000> : vector<256xf32>
    %33 = vector.multi_reduction <maximumf>, %32, %cst_26 [0] : vector<128x256xf32> to vector<256xf32>
    %34 = vector.shape_cast %33 : vector<256xf32> to vector<1x256xf32>
    %35 = tpu.concatenate %22, %26, %30, %34 in 1 : vector<1x256xf32>, vector<1x256xf32>, vector<1x256xf32>, vector<1x256xf32> -> vector<1x1024xf32>
    %c0_i32 = arith.constant 0 : i32
    %36 = arith.cmpi eq, %arg2, %c0_i32 : i32
    %37 = arith.extui %36 : i1 to i32
    %c0_i32_27 = arith.constant 0 : i32
    %38 = arith.cmpi ne, %37, %c0_i32_27 : i32
    scf.if %38 {
      %c0_30 = arith.constant 0 : index
      %c0_31 = arith.constant 0 : index
      %c0_32 = arith.constant 0 : index
      %42 = vector.load %arg9[%c0_30, %c0_31, %c0_32] : memref<1x1x1024xf32, #tpu.memory_space<vmem>>, vector<1x1x1024xf32>
      %43 = vector.shape_cast %42 : vector<1x1x1024xf32> to vector<1x1024xf32>
      %44 = vector.shape_cast %35 : vector<1x1024xf32> to vector<1x1x1024xf32>
      tpu.vector_store %arg9[%c0_30, %c0_31, %c0_32], %44 {strides = array<i32>} : memref<1x1x1024xf32, #tpu.memory_space<vmem>>, vector<1x1x1024xf32>,
    } else {
    }
    %c0_i32_28 = arith.constant 0 : i32
    %39 = arith.cmpi sgt, %arg2, %c0_i32_28 : i32
    %40 = arith.extui %39 : i1 to i32
    %c0_i32_29 = arith.constant 0 : i32
    %41 = arith.cmpi ne, %40, %c0_i32_29 : i32
    scf.if %41 {
      %c0_30 = arith.constant 0 : index
      %c0_31 = arith.constant 0 : index
      %c0_32 = arith.constant 0 : index
      %42 = vector.load %arg9[%c0_30, %c0_31, %c0_32] : memref<1x1x1024xf32, #tpu.memory_space<vmem>>, vector<1x1x1024xf32>
      %43 = vector.shape_cast %42 : vector<1x1x1024xf32> to vector<1x1024xf32>
      %44 = arith.maximumf %43, %35 : vector<1x1024xf32>
      %c0_33 = arith.constant 0 : index
      %c0_34 = arith.constant 0 : index
      %c0_35 = arith.constant 0 : index
      %45 = vector.load %arg9[%c0_33, %c0_34, %c0_35] : memref<1x1x1024xf32, #tpu.memory_space<vmem>>, vector<1x1x1024xf32>
      %46 = vector.shape_cast %45 : vector<1x1x1024xf32> to vector<1x1024xf32>
      %47 = vector.shape_cast %44 : vector<1x1024xf32> to vector<1x1x1024xf32>
      tpu.vector_store %arg9[%c0_33, %c0_34, %c0_35], %47 {strides = array<i32>} : memref<1x1x1024xf32, #tpu.memory_space<vmem>>, vector<1x1x1024xf32>,
    } else {
    }
    return
  }
  func.func @transform_0(%arg0: i32, %arg1: i32, %arg2: i32) -> (i32, i32, i32) {
    %c2_i32 = arith.constant 2 : i32
    %0 = arith.muli %arg1, %c2_i32 : i32
    %1 = arith.addi %0, %arg2 : i32
    %c0_i32 = arith.constant 0 : i32
    %c0_i32_0 = arith.constant 0 : i32
    return %arg0, %1, %c0_i32 : i32, i32, i32
  }
  func.func @transform_1(%arg0: i32, %arg1: i32, %arg2: i32) -> (i32, i32, i32) {
    %c0_i32 = arith.constant 0 : i32
    %c0_i32_0 = arith.constant 0 : i32
    %c0_i32_1 = arith.constant 0 : i32
    %c0_i32_2 = arith.constant 0 : i32
    return %c0_i32, %c0_i32_0, %c0_i32_1 : i32, i32, i32
  }
  func.func @transform_2(%arg0: i32, %arg1: i32, %arg2: i32) -> (i32, i32) {
    %c0_i32 = arith.constant 0 : i32
    %c0_i32_0 = arith.constant 0 : i32
    %c0_i32_1 = arith.constant 0 : i32
    return %c0_i32, %c0_i32_0 : i32, i32
  }
  func.func @transform_3(%arg0: i32, %arg1: i32, %arg2: i32) -> (i32, i32) {
    %c0_i32 = arith.constant 0 : i32
    %c0_i32_0 = arith.constant 0 : i32
    %c0_i32_1 = arith.constant 0 : i32
    return %c0_i32, %c0_i32_0 : i32, i32
  }
  func.func @transform_4(%arg0: i32, %arg1: i32, %arg2: i32) -> (i32, i32) {
    %c0_i32 = arith.constant 0 : i32
    %c0_i32_0 = arith.constant 0 : i32
    %c0_i32_1 = arith.constant 0 : i32
    return %c0_i32, %c0_i32_0 : i32, i32
  }
  func.func @transform_5(%arg0: i32, %arg1: i32, %arg2: i32) -> (i32, i32) {
    %c0_i32 = arith.constant 0 : i32
    %c0_i32_0 = arith.constant 0 : i32
    %c0_i32_1 = arith.constant 0 : i32
    return %c0_i32, %c0_i32_0 : i32, i32
  }
  func.func @transform_6(%arg0: i32, %arg1: i32, %arg2: i32) -> (i32, i32, i32) {
    %c0_i32 = arith.constant 0 : i32
    %c0_i32_0 = arith.constant 0 : i32
    return %arg0, %c0_i32, %arg1 : i32, i32, i32
  }
}

module attributes {stable_mosaic.version = 11 : i64} {
  func.func @_encoder_kernel(%arg0: i32, %arg1: i32, %arg2: i32, %arg3: memref<1x128x8xbf16, #tpu.memory_space<vmem>>, %arg4: memref<1x8x64xbf16, #tpu.memory_space<vmem>>, %arg5: memref<64x128xbf16, #tpu.memory_space<vmem>>, %arg6: memref<128x1024xbf16, #tpu.memory_space<vmem>>, %arg7: memref<1x64xf32, #tpu.memory_space<vmem>>, %arg8: memref<1x128xf32, #tpu.memory_space<vmem>>, %arg9: memref<1x1x1024xf32, #tpu.memory_space<vmem>>) attributes {dimension_semantics = [#tpu.dimension_semantics<parallel>, #tpu.dimension_semantics<parallel>, #tpu.dimension_semantics<arbitrary>], iteration_bounds = array<i64: 2, 1, 2>, scalar_prefetch = 0 : i64, scratch_operands = 0 : i64, tpu.core_type = #tpu.core_type<tc>, window_params = [{transform_indices = @transform_0, window_bounds = array<i64: 1, 128, 8>}, {transform_indices = @transform_1, window_bounds = array<i64: 1, 8, 64>}, {pipeline_mode = #tpu.pipeline_mode<synchronous>, transform_indices = @transform_2, window_bounds = array<i64: 64, 128>}, {pipeline_mode = #tpu.pipeline_mode<synchronous>, transform_indices = @transform_3, window_bounds = array<i64: 128, 1024>}, {pipeline_mode = #tpu.pipeline_mode<synchronous>, transform_indices = @transform_4, window_bounds = array<i64: 1, 64>}, {pipeline_mode = #tpu.pipeline_mode<synchronous>, transform_indices = @transform_5, window_bounds = array<i64: 1, 128>}, {transform_indices = @transform_6, window_bounds = array<i64: 1, 1, 1024>}]} {
    %c0 = arith.constant 0 : index
    %c0_0 = arith.constant 0 : index
    %c0_1 = arith.constant 0 : index
    %0 = vector.load %arg3[%c0, %c0_0, %c0_1] : memref<1x128x8xbf16, #tpu.memory_space<vmem>>, vector<1x128x8xbf16>
    %1 = vector.shape_cast %0 : vector<1x128x8xbf16> to vector<128x8xbf16>
    %c0_2 = arith.constant 0 : index
    %c0_3 = arith.constant 0 : index
    %c0_4 = arith.constant 0 : index
    %2 = vector.load %arg4[%c0_2, %c0_3, %c0_4] : memref<1x8x64xbf16, #tpu.memory_space<vmem>>, vector<1x8x64xbf16>
    %3 = vector.shape_cast %2 : vector<1x8x64xbf16> to vector<8x64xbf16>
    %cst = arith.constant dense<0.000000e+00> : vector<128x64xf32>
    %4 = tpu.matmul %1, %3, %cst {dimension_numbers = #tpu.dot_dimension_numbers<[1], [0], [0], [1], [0, 0, 1, 1], [], []>} : vector<128x8xbf16>, vector<8x64xbf16>, vector<128x64xf32> -> vector<128x64xf32>
    %c0_5 = arith.constant 0 : index
    %c0_6 = arith.constant 0 : index
    %5 = vector.load %arg7[%c0_5, %c0_6] : memref<1x64xf32, #tpu.memory_space<vmem>>, vector<1x64xf32>
    %6 = vector.broadcast %5 : vector<1x64xf32> to vector<128x64xf32>
    %7 = arith.addf %4, %6 : vector<128x64xf32>
    %cst_7 = arith.constant 0.000000e+00 : f32
    %8 = vector.broadcast %cst_7 : f32 to vector<128x64xf32>
    %9 = arith.maximumf %7, %8 : vector<128x64xf32>
    %10 = arith.truncf %9 : vector<128x64xf32> to vector<128x64xbf16>
    %c0_8 = arith.constant 0 : index
    %c0_9 = arith.constant 0 : index
    %11 = vector.load %arg5[%c0_8, %c0_9] : memref<64x128xbf16, #tpu.memory_space<vmem>>, vector<64x128xbf16>
    %cst_10 = arith.constant dense<0.000000e+00> : vector<128x128xf32>
    %12 = tpu.matmul %10, %11, %cst_10 {dimension_numbers = #tpu.dot_dimension_numbers<[1], [0], [0], [1], [0, 0, 1, 1], [], []>} : vector<128x64xbf16>, vector<64x128xbf16>, vector<128x128xf32> -> vector<128x128xf32>
    %c0_11 = arith.constant 0 : index
    %c0_12 = arith.constant 0 : index
    %13 = vector.load %arg8[%c0_11, %c0_12] : memref<1x128xf32, #tpu.memory_space<vmem>>, vector<1x128xf32>
    %14 = vector.broadcast %13 : vector<1x128xf32> to vector<128x128xf32>
    %15 = arith.addf %12, %14 : vector<128x128xf32>
    %cst_13 = arith.constant 0.000000e+00 : f32
    %16 = vector.broadcast %cst_13 : f32 to vector<128x128xf32>
    %17 = arith.maximumf %15, %16 : vector<128x128xf32>
    %18 = arith.truncf %17 : vector<128x128xf32> to vector<128x128xbf16>
    %c0_14 = arith.constant 0 : index
    %c0_15 = arith.constant 0 : index
    %19 = vector.load %arg6[%c0_14, %c0_15] : memref<128x1024xbf16, #tpu.memory_space<vmem>>, vector<128x256xbf16>
    %cst_16 = arith.constant dense<0.000000e+00> : vector<128x256xf32>
    %20 = tpu.matmul %18, %19, %cst_16 {dimension_numbers = #tpu.dot_dimension_numbers<[1], [0], [0], [1], [0, 0, 1, 1], [], []>} : vector<128x128xbf16>, vector<128x256xbf16>, vector<128x256xf32> -> vector<128x256xf32>
    %cst_17 = arith.constant dense<0xFF800000> : vector<256xf32>
    %21 = vector.multi_reduction <maximumf>, %20, %cst_17 [0] : vector<128x256xf32> to vector<256xf32>
    %22 = vector.shape_cast %21 : vector<256xf32> to vector<1x256xf32>
    %c0_18 = arith.constant 0 : index
    %c256 = arith.constant 256 : index
    %23 = vector.load %arg6[%c0_18, %c256] : memref<128x1024xbf16, #tpu.memory_space<vmem>>, vector<128x256xbf16>
    %cst_19 = arith.constant dense<0.000000e+00> : vector<128x256xf32>
    %24 = tpu.matmul %18, %23, %cst_19 {dimension_numbers = #tpu.dot_dimension_numbers<[1], [0], [0], [1], [0, 0, 1, 1], [], []>} : vector<128x128xbf16>, vector<128x256xbf16>, vector<128x256xf32> -> vector<128x256xf32>
    %cst_20 = arith.constant dense<0xFF800000> : vector<256xf32>
    %25 = vector.multi_reduction <maximumf>, %24, %cst_20 [0] : vector<128x256xf32> to vector<256xf32>
    %26 = vector.shape_cast %25 : vector<256xf32> to vector<1x256xf32>
    %c0_21 = arith.constant 0 : index
    %c512 = arith.constant 512 : index
    %27 = vector.load %arg6[%c0_21, %c512] : memref<128x1024xbf16, #tpu.memory_space<vmem>>, vector<128x256xbf16>
    %cst_22 = arith.constant dense<0.000000e+00> : vector<128x256xf32>
    %28 = tpu.matmul %18, %27, %cst_22 {dimension_numbers = #tpu.dot_dimension_numbers<[1], [0], [0], [1], [0, 0, 1, 1], [], []>} : vector<128x128xbf16>, vector<128x256xbf16>, vector<128x256xf32> -> vector<128x256xf32>
    %cst_23 = arith.constant dense<0xFF800000> : vector<256xf32>
    %29 = vector.multi_reduction <maximumf>, %28, %cst_23 [0] : vector<128x256xf32> to vector<256xf32>
    %30 = vector.shape_cast %29 : vector<256xf32> to vector<1x256xf32>
    %c0_24 = arith.constant 0 : index
    %c768 = arith.constant 768 : index
    %31 = vector.load %arg6[%c0_24, %c768] : memref<128x1024xbf16, #tpu.memory_space<vmem>>, vector<128x256xbf16>
    %cst_25 = arith.constant dense<0.000000e+00> : vector<128x256xf32>
    %32 = tpu.matmul %18, %31, %cst_25 {dimension_numbers = #tpu.dot_dimension_numbers<[1], [0], [0], [1], [0, 0, 1, 1], [], []>} : vector<128x128xbf16>, vector<128x256xbf16>, vector<128x256xf32> -> vector<128x256xf32>
    %cst_26 = arith.constant dense<0xFF800000> : vector<256xf32>
    %33 = vector.multi_reduction <maximumf>, %32, %cst_26 [0] : vector<128x256xf32> to vector<256xf32>
    %34 = vector.shape_cast %33 : vector<256xf32> to vector<1x256xf32>
    %35 = tpu.concatenate %22, %26, %30, %34 in 1 : vector<1x256xf32>, vector<1x256xf32>, vector<1x256xf32>, vector<1x256xf32> -> vector<1x1024xf32>
    %c0_i32 = arith.constant 0 : i32
    %36 = arith.cmpi eq, %arg2, %c0_i32 : i32
    %37 = arith.extui %36 : i1 to i32
    %c0_i32_27 = arith.constant 0 : i32
    %38 = arith.cmpi ne, %37, %c0_i32_27 : i32
    scf.if %38 {
      %c0_30 = arith.constant 0 : index
      %c0_31 = arith.constant 0 : index
      %c0_32 = arith.constant 0 : index
      %42 = vector.load %arg9[%c0_30, %c0_31, %c0_32] : memref<1x1x1024xf32, #tpu.memory_space<vmem>>, vector<1x1x1024xf32>
      %43 = vector.shape_cast %42 : vector<1x1x1024xf32> to vector<1x1024xf32>
      %44 = vector.shape_cast %35 : vector<1x1024xf32> to vector<1x1x1024xf32>
      tpu.vector_store %arg9[%c0_30, %c0_31, %c0_32], %44 {strides = array<i32>} : memref<1x1x1024xf32, #tpu.memory_space<vmem>>, vector<1x1x1024xf32>,
    } else {
    }
    %c0_i32_28 = arith.constant 0 : i32
    %39 = arith.cmpi sgt, %arg2, %c0_i32_28 : i32
    %40 = arith.extui %39 : i1 to i32
    %c0_i32_29 = arith.constant 0 : i32
    %41 = arith.cmpi ne, %40, %c0_i32_29 : i32
    scf.if %41 {
      %c0_30 = arith.constant 0 : index
      %c0_31 = arith.constant 0 : index
      %c0_32 = arith.constant 0 : index
      %42 = vector.load %arg9[%c0_30, %c0_31, %c0_32] : memref<1x1x1024xf32, #tpu.memory_space<vmem>>, vector<1x1x1024xf32>
      %43 = vector.shape_cast %42 : vector<1x1x1024xf32> to vector<1x1024xf32>
      %44 = arith.maximumf %43, %35 : vector<1x1024xf32>
      %c0_33 = arith.constant 0 : index
      %c0_34 = arith.constant 0 : index
      %c0_35 = arith.constant 0 : index
      %45 = vector.load %arg9[%c0_33, %c0_34, %c0_35] : memref<1x1x1024xf32, #tpu.memory_space<vmem>>, vector<1x1x1024xf32>
      %46 = vector.shape_cast %45 : vector<1x1x1024xf32> to vector<1x1024xf32>
      %47 = vector.shape_cast %44 : vector<1x1024xf32> to vector<1x1x1024xf32>
      tpu.vector_store %arg9[%c0_33, %c0_34, %c0_35], %47 {strides = array<i32>} : memref<1x1x1024xf32, #tpu.memory_space<vmem>>, vector<1x1x1024xf32>,
    } else {
    }
    return
  }
  func.func @transform_0(%arg0: i32, %arg1: i32, %arg2: i32) -> (i32, i32, i32) {
    %c2_i32 = arith.constant 2 : i32
    %0 = arith.muli %arg1, %c2_i32 : i32
    %1 = arith.addi %0, %arg2 : i32
    %c0_i32 = arith.constant 0 : i32
    %c0_i32_0 = arith.constant 0 : i32
    return %arg0, %1, %c0_i32 : i32, i32, i32
  }
  func.func @transform_1(%arg0: i32, %arg1: i32, %arg2: i32) -> (i32, i32, i32) {
    %c0_i32 = arith.constant 0 : i32
    %c0_i32_0 = arith.constant 0 : i32
    %c0_i32_1 = arith.constant 0 : i32
    return %arg0, %c0_i32, %c0_i32_0 : i32, i32, i32
  }
  func.func @transform_2(%arg0: i32, %arg1: i32, %arg2: i32) -> (i32, i32) {
    %c0_i32 = arith.constant 0 : i32
    %c0_i32_0 = arith.constant 0 : i32
    %c0_i32_1 = arith.constant 0 : i32
    return %c0_i32, %c0_i32_0 : i32, i32
  }
  func.func @transform_3(%arg0: i32, %arg1: i32, %arg2: i32) -> (i32, i32) {
    %c0_i32 = arith.constant 0 : i32
    %c0_i32_0 = arith.constant 0 : i32
    %c0_i32_1 = arith.constant 0 : i32
    return %c0_i32, %c0_i32_0 : i32, i32
  }
  func.func @transform_4(%arg0: i32, %arg1: i32, %arg2: i32) -> (i32, i32) {
    %c0_i32 = arith.constant 0 : i32
    %c0_i32_0 = arith.constant 0 : i32
    %c0_i32_1 = arith.constant 0 : i32
    return %c0_i32, %c0_i32_0 : i32, i32
  }
  func.func @transform_5(%arg0: i32, %arg1: i32, %arg2: i32) -> (i32, i32) {
    %c0_i32 = arith.constant 0 : i32
    %c0_i32_0 = arith.constant 0 : i32
    %c0_i32_1 = arith.constant 0 : i32
    return %c0_i32, %c0_i32_0 : i32, i32
  }
  func.func @transform_6(%arg0: i32, %arg1: i32, %arg2: i32) -> (i32, i32, i32) {
    %c0_i32 = arith.constant 0 : i32
    %c0_i32_0 = arith.constant 0 : i32
    return %arg0, %c0_i32, %arg1 : i32, i32, i32
  }
}

</mosaic_0001>

<bundles_post_ra>
// kernel: pointnetfeat_forward.2
= control target key start
LH: loop header
LB: loop body
LE: loop exit
PB: predicated region body
PF: predicated region fallthrough
CT: control target
= control target key end

     0   :  { %s2233_s21 = smov 0   ;;  %s2235_s22 = smov 0   ;;  %s2660_s0 = inlined_call_operand.vmem [shape: bf16[2,256,8], index: 0, kind: input, shape index: {}]   ;;  %s2661_s1 = inlined_call_operand.vmem [shape: bf16[1,8,64], index: 1, kind: input, shape index: {}]   ;;  %s2662_s2 = inlined_call_operand.vmem [shape: bf16[64,128], index: 2, kind: input, shape index: {}]   ;;  %s2663_s3 = inlined_call_operand.vmem [shape: bf16[128,1024], index: 3, kind: input, shape index: {}]   ;;  %s2664_s4 = inlined_call_operand.vmem [shape: f32[1,64], index: 4, kind: input, shape index: {}]   ;;  %s2665_s5 = inlined_call_operand.vmem [shape: f32[1,128], index: 5, kind: input, shape index: {}]   ;;  %s2666_s6 = inlined_call_operand.vmem [shape: f32[2,1,1024], index: 6, kind: output, shape index: {}]  }
   0x1   :  { %s2237_s23 = smov 0   ;;  %s2239_s24 = smov 0  }
   0x2   :  { %s2241_s25 = smov 0  }
   0x3 LB: > { %s28_s26 = sadd.s32 1, %s2185_s23  ;;  %s35_s27 = sadd.s32 1, %s2189_s24  ;;  %s2193_s25 = sphi %s2241_s25, %s16_s25   ;;  %s2189_s24 = sphi %s2239_s24, %s2670_s24   ;;  %s2185_s23 = sphi %s2237_s23, %s2669_s23   ;;  %s2181_s22 = sphi %s2235_s22, %s2668_s22   ;;  %s2177_s21 = sphi %s2233_s21, %s2667_s21  }
   0x4   : > { %p29_p0 = scmp.ge.s32.totalorder %s28_s26, 2  ;;  %p1933_p1 = scmp.ge.s32.totalorder %s2193_s25, 1 }
   0x5   : > { %p248_p2 = scmp.lt.s32.totalorder %s2193_s25, 5 }
   0x6   : > { %s2672_s26 = smov (%p29_p0, %s28_s26), 0  ;;  %s2674_s27 = smov (!%p29_p0, %s35_s27), %s2189_s24 }
   0x7   : > { %p249_p3 = pnand %p1933_p1, %p248_p2  ;;  %p37_p4 = scmp.ge.s32.totalorder %s2674_s27, 2 }
   0x8   : > { %v327_v0 = vld [vmem:[%s2661_s1] sm:$0xf] (!%p249_p3)  ;;  %vm400_vm0 = vcmask (!%p249_p3), 1043456   ;;  %s1934_s30 = sshll.u32 (!%p249_p3), %s2177_s21, 4  ;;  %p290_p5 = scmp.lt.s32.totalorder (!%p249_p3), %s2181_s22, 1  ;;  %v2152_v3 = vld [vmem:[%s2662_s2 + $0x8] sm:$0xff] (!%p249_p3)  }
   0x9   : > { %s2676_s27 = smov (%p37_p4, %s2674_s27), 0  ;;  %252 = sbr.rel (%p249_p3) target bundleno = 847 (0x34f), region = 44 }
   0xa   : > { %2099 = vmatprep.subr.msk.bf16.mxu0 (!%p249_p3), %vm400_vm0, %v327_v0  ;;  %v402_v1 = vsel (!%p249_p3), %vm400_vm0, %v327_v0, 0  ;;  %p292_p6 = scmp.lt.s32.totalorder (!%p249_p3), %s1934_s30, 31  ;;  %v2151_v2 = vld [vmem:[%s2662_s2] sm:$0xff] (!%p249_p3)   ;;  %vm375_vm1 = vcmask (!%p249_p3), 64512   ;;  %v2153_v12 = vld [vmem:[%s2662_s2 + $0x10] sm:$0xff] (!%p249_p3)   ;;  %v2154_v13 = vld [vmem:[%s2662_s2 + $0x18] sm:$0xff] (!%p249_p3)  }
   0xb   : > { %2058 = vmatpush3.bf16.msra.mxu0 (!%p249_p3), %v402_v1  ;;  %2075 = vmatprep.subr.bf16.mxu1 (!%p249_p3), %v2151_v2  ;;  %v710_v14 = vld [vmem:[%s2663_s3] sm:$0xff] (!%p249_p3)  ;;  %v2306_v16 = vld [vmem:[%s2663_s3 + $0x8] sm:$0xff] (!%p249_p3)  ;;  %vm564_vm2 = vcmask (!%p249_p3), 523264   ;;  %p2032_p7 = scmp.ne.s32.totalorder (!%p249_p3), %s2177_s21, 0 }
   0xc   : > { %2076 = vmatpush3.bf16.msra.mxu1 (!%p249_p3), %v2151_v2  ;;  %v711_v15 = vld [vmem:[%s2663_s3 + $0x20] sm:$0xff] (!%p249_p3)  ;;  %v2311_v19 = vld [vmem:[%s2663_s3 + $0x28] sm:$0xff] (!%p249_p3) }
   0xd   : > { %2077 = vmatprep.subr.bf16.mxu1 (!%p249_p3), %v2152_v3  ;;  %v1968_v17 = vcombine.low (!%p249_p3), %v710_v14, %v711_v15  ;;  %v1969_v18 = vcombine.high (!%p249_p3), %v710_v14, %v711_v15  ;;  %v712_v20 = vld [vmem:[%s2663_s3 + $0x40] sm:$0xff] (!%p249_p3)  ;;  %v1984_v22 = vcombine.low (!%p249_p3), %v2306_v16, %v2311_v19  ;;  %v1985_v23 = vcombine.high (!%p249_p3), %v2306_v16, %v2311_v19  ;;  %v963_v55 = vld [vmem:[%s2663_s3 + $0x48] sm:$0xff] (!%p249_p3) }
   0xe   : > { %v713_v21 = vld [vmem:[%s2663_s3 + $0x60] sm:$0xff] (!%p249_p3)  ;;  %v964_v56 = vld [vmem:[%s2663_s3 + $0x68] sm:$0xff] (!%p249_p3) }
   0xf   : > { %v1971_v24 = vcombine.high (!%p249_p3), %v712_v20, %v713_v21  ;;  %v714_v25 = vld [vmem:[%s2663_s3 + $0x80] sm:$0xff] (!%p249_p3)  ;;  %806 = vmatprep.subr.bf16.mxu0 (!%p249_p3), %v1969_v18  ;;  %v1970_v27 = vcombine.low (!%p249_p3), %v712_v20, %v713_v21  ;;  %v1987_v62 = vcombine.high (!%p249_p3), %v963_v55, %v964_v56  ;;  %v965_v1 = vld [vmem:[%s2663_s3 + $0x88] sm:$0xff] (!%p249_p3) }
  0x10   : > { %s2678_s22 = smov (!%p290_p5, %s2181_s22), 1  ;;  %s2680_s30 = smov (!%p292_p6, %s1934_s30), 31  ;;  %2078 = vmatpush3.bf16.msra.mxu1 %v2152_v3  ;;  %v715_v26 = vld [vmem:[%s2663_s3 + $0xa0] sm:$0xff]  ;;  %v966_v2 = vld [vmem:[%s2663_s3 + $0xa8] sm:$0xff] }
  0x11   : > { %s1935_s11 = sshll.u32 %s2678_s22, 5  ;;  %s1937_s12 = sshll.u32 %s2678_s22, 3  ;;  %2079 = vmatprep.subr.bf16.mxu1 %v2153_v12  ;;  %v1973_v28 = vcombine.high %v714_v25, %v715_v26  ;;  %v716_v29 = vld [vmem:[%s2663_s3 + $0xc0] sm:$0xff]  ;;  %v1972_v31 = vcombine.low %v714_v25, %v715_v26  ;;  %v1988_v18 = vcombine.low %v965_v1, %v966_v2 }
  0x12   : > { %s295_s13 = sadd.s32 %s1935_s11, %s2680_s30  ;;  %s2278_s16 = scalar_lea.vmem %s2666_s6, %s1937_s12  ;;  %v717_v30 = vld [vmem:[%s2663_s3 + $0xe0] sm:$0xff] }
  0x13   : > { %s1936_s17 = sshll.u32 %s295_s13, 2  ;;  %v1975_v32 = vcombine.high %v716_v29, %v717_v30  ;;  %v718_v33 = vld [vmem:[%s2663_s3 + $0x100] sm:$0xff]  ;;  %v1974_v35 = vcombine.low %v716_v29, %v717_v30 }
  0x14   : > { %s297_s20 = scalar_lea.vmem %s2660_s0, %s1936_s17  ;;  %2080 = vmatpush3.bf16.msra.mxu1 %v2153_v12  ;;  %v719_v34 = vld [vmem:[%s2663_s3 + $0x120] sm:$0xff]  ;;  %v967_v12 = vld [vmem:[%s2663_s3 + $0xc8] sm:$0xff] }
  0x15   : > { %v2143_v4 = vld [vmem:[%s297_s20] sm:$0xff]   ;;  %v2144_v5 = vld [vmem:[%s297_s20 + $0x8] sm:$0xff]   ;;  %v2145_v6 = vld [vmem:[%s297_s20 + $0x10] sm:$0xff]   ;;  %2081 = vmatprep.subr.bf16.mxu1 %v2154_v13  ;;  %v1977_v36 = vcombine.high %v718_v33, %v719_v34  ;;  %v1976_v39 = vcombine.low %v718_v33, %v719_v34 }
  0x16   : > { %2059 = vmatprep.mubr.msk.bf16.mxu0 %vm375_vm1, %v2143_v4  ;;  %v2146_v7 = vld [vmem:[%s297_s20 + $0x18] sm:$0xff]   ;;  %v2147_v8 = vld [vmem:[%s297_s20 + $0x20] sm:$0xff]   ;;  %v2148_v9 = vld [vmem:[%s297_s20 + $0x28] sm:$0xff]  }
  0x17   : > { %2060 = vmatmul.mubr.msk.bf16.vlgmr.msra.gmra.mrb[0].mxu0 %vm375_vm1, %v2144_v5  ;;  %v2149_v10 = vld [vmem:[%s297_s20 + $0x30] sm:$0xff]   ;;  %v2150_v11 = vld [vmem:[%s297_s20 + $0x38] sm:$0xff]   ;;  %v720_v37 = vld [vmem:[%s2663_s3 + $0x140] sm:$0xff] }
  0x18   : > { %2063 = vmatprep.mubr.msk.bf16.mxu0 %vm375_vm1, %v2145_v6  ;;  %2082 = vmatpush3.bf16.msra.mxu1 %v2154_v13  ;;  %v721_v38 = vld [vmem:[%s2663_s3 + $0x160] sm:$0xff]  ;;  %v968_v13 = vld [vmem:[%s2663_s3 + $0xe8] sm:$0xff] }
  0x19   : > { %1057 = vmatprep.subr.bf16.mxu1 %v1985_v23  ;;  %807 = vmatpush1.bf16.msra.mxu0 %v1968_v17  ;;  %v1979_v40 = vcombine.high %v720_v37, %v721_v38  ;;  %v1978_v41 = vcombine.low %v720_v37, %v721_v38  ;;  %v2350_v42 = vld [vmem:[%s2664_s4] ss:$0 sm:$0xff]  ;;  %v1991_v20 = vcombine.high %v967_v12, %v968_v13  ;;  %v969_v23 = vld [vmem:[%s2663_s3 + $0x108] sm:$0xff] }
  0x1a   : > { %808 = vmatprep.subr.bf16.mxu0 %v1971_v24  ;;  %v970_v24 = vld [vmem:[%s2663_s3 + $0x128] sm:$0xff]  ;;  %v1990_v30 = vcombine.low %v967_v12, %v968_v13  ;;  %v1464_v13 = vld [vmem:[%s2663_s3 + $0x38] sm:$0xff] }
  0x1b   : > { %v971_v34 = vld [vmem:[%s2663_s3 + $0x148] sm:$0xff] }
  0x1d   : > { %809 = vmatpush1.bf16.msra.mxu0 %v1970_v27 }
  0x1e   : > { %810 = vmatprep.subr.bf16.mxu0 %v1973_v28 }
  0x1f   : > { %2064 = vmatmul.mubr.msk.bf16.gmra.mrb[4].mxu0 %vm375_vm1, %v2146_v7 }
  0x20   : > { %2067 = vmatprep.mubr.msk.bf16.mxu0 %vm375_vm1, %v2147_v8  ;;  %v1986_v8 = vcombine.low %v963_v55, %v964_v56  ;;  %v722_v56 = vld [vmem:[%s2663_s3 + $0x180] sm:$0xff] }
  0x21   : > { %811 = vmatpush1.bf16.msra.mxu0 %v1972_v31 }
  0x22   : > { %812 = vmatprep.subr.bf16.mxu0 %v1975_v32  ;;  %v1993_v32 = vcombine.high %v969_v23, %v970_v24 }
  0x25   : > { %813 = vmatpush1.bf16.msra.mxu0 %v1974_v35  ;;  %v972_v35 = vld [vmem:[%s2663_s3 + $0x168] sm:$0xff] }
  0x26   : > { %814 = vmatprep.subr.bf16.mxu0 %v1977_v36 }
  0x27   : > { %2068 = vmatmul.mubr.msk.bf16.gmra.mrb[8].mxu0 %vm375_vm1, %v2148_v9 }
  0x28   : > { %2071 = vmatprep.mubr.msk.bf16.mxu0 %vm375_vm1, %v2149_v10  ;;  %v1989_v10 = vcombine.high %v965_v1, %v966_v2  ;;  %v975_v1 = vld [vmem:[%s2663_s3 + $0x1c8] sm:$0xff] }
  0x29   : > { %815 = vmatpush1.bf16.msra.mxu0 %v1976_v39  ;;  %v1992_v39 = vcombine.low %v969_v23, %v970_v24 }
  0x2a   : > { %816 = vmatprep.subr.bf16.mxu0 %v1979_v40 }
  0x2d   : > { %817 = vmatpush1.bf16.msra.mxu0 %v1978_v41 }
  0x2f   : > { %2072 = vmatmul.mubr.msk.bf16.gmra.mrb[12].mxu0 %vm375_vm1, %v2150_v11 }
  0xea   : > { %v2061_v43 = vpop.f32.mrb[0].mxu0 }
  0xeb   : > { %v447_v44 = vadd.f32 %v2061_v43, %v2350_v42  ;;  %v438_v45 = vpop.f32.mrb[1].mxu0  ;;  %v1995_v43 = vcombine.high %v971_v34, %v972_v35 }
  0xec   : > { %v439_v46 = vadd.f32 %v2350_v42, %v438_v45  ;;  %v2062_v47 = vpop.f32.mrb[2].mxu0 }
  0xed   : > { %v450_v48 = vadd.f32 %v2062_v47, %v2350_v42  ;;  %v441_v49 = vpop.f32.mrb[3].mxu0  ;;  %v503_v51 = vmax.f32 %v447_v44, 0.0 }
  0xee   : > { %v442_v50 = vadd.f32 %v2350_v42, %v441_v49  ;;  %v501_v53 = vmax.f32 %v439_v46, 0.0 }
  0xef   : > { %v504_v52 = vmax.f32 %v450_v48, 0.0 }
  0xf0   : > { %v502_v54 = vmax.f32 %v442_v50, 0.0 }
  0xf1   : > { %v518_v57 = vpack.c.bf16 %v504_v52, %v503_v51  ;;  %v1994_v51 = vcombine.low %v971_v34, %v972_v35 }
  0xf2   : > { %v2065_v58 = vpop.f32.mrb[4].mxu0  ;;  %v517_v59 = vpack.c.bf16 %v502_v54, %v501_v53 }
  0xf3   : > { %v463_v60 = vadd.f32 %v2065_v58, %v2350_v42  ;;  %v454_v61 = vpop.f32.mrb[5].mxu0 }
  0xf4   : > { %v455_v63 = vadd.f32 %v2350_v42, %v454_v61  ;;  %2083 = vmatprep.mubr.msk.bf16.mxu1 %vm564_vm2, %v517_v59  ;;  %v2066_v0 = vpop.f32.mrb[6].mxu0  ;;  %v974_v59 = vld [vmem:[%s2663_s3 + $0x1a8] sm:$0xff] }
  0xf5   : > { %v507_v3 = vmax.f32 %v463_v60, 0.0  ;;  %v466_v4 = vadd.f32 %v2066_v0, %v2350_v42  ;;  %2084 = vmatmul.mubr.msk.bf16.vlgmr.msra.gmra.mrb[0].mxu1 %vm564_vm2, %v518_v57  ;;  %v457_v5 = vpop.f32.mrb[7].mxu0  ;;  %v973_v57 = vld [vmem:[%s2663_s3 + $0x188] sm:$0xff]  ;;  %v725_v0 = vld [vmem:[%s2663_s3 + $0x1e0] sm:$0xff] }
  0xf6   : > { %v505_v6 = vmax.f32 %v455_v63, 0.0  ;;  %v458_v7 = vadd.f32 %v2350_v42, %v457_v5  ;;  %1058 = vmatpush1.bf16.msra.mxu1 %v1984_v22  ;;  %v1996_v61 = vcombine.low %v973_v57, %v974_v59  ;;  %v724_v63 = vld [vmem:[%s2663_s3 + $0x1c0] sm:$0xff] }
  0xf7   : > { %v508_v9 = vmax.f32 %v466_v4, 0.0  ;;  %1059 = vmatprep.subr.bf16.mxu1 %v1987_v62  ;;  %v1997_v62 = vcombine.high %v973_v57, %v974_v59  ;;  %v1983_v2 = vcombine.high %v724_v63, %v725_v0  ;;  %v1982_v4 = vcombine.low %v724_v63, %v725_v0  ;;  %v1469_v59 = vld [vmem:[%s2663_s3 + $0xd8] sm:$0xff] }
  0xf8   : > { %v506_v11 = vmax.f32 %v458_v7, 0.0  ;;  %v2195_v7 = vmov 0  }
  0xf9   : > { %v520_v14 = vpack.c.bf16 %v508_v9, %v507_v3  ;;  %v976_v3 = vld [vmem:[%s2663_s3 + $0x1e8] sm:$0xff]  ;;  %838 = vmatprep.mubr.bf16.mxu0 %v2195_v7  ;;  %v1213_v9 = vld [vmem:[%s2663_s3 + $0x30] sm:$0xff] }
  0xfa   : > { %v519_v15 = vpack.c.bf16 %v506_v11, %v505_v6  ;;  %v2069_v17 = vpop.f32.mrb[8].mxu0  ;;  %1060 = vmatpush1.bf16.msra.mxu1 %v1986_v8  ;;  %v1998_v5 = vcombine.low %v975_v1, %v976_v3  ;;  %v1999_v6 = vcombine.high %v975_v1, %v976_v3  ;;  %v1212_v8 = vld [vmem:[%s2663_s3 + $0x10] sm:$0xff] }
  0xfb   : > { %v479_v16 = vadd.f32 %v2069_v17, %v2350_v42  ;;  %v470_v19 = vpop.f32.mrb[9].mxu0  ;;  %1061 = vmatprep.subr.bf16.mxu1 %v1989_v10  ;;  %v1463_v10 = vld [vmem:[%s2663_s3 + $0x18] sm:$0xff]  ;;  %v2000_v11 = vcombine.low %v1212_v8, %v1213_v9  ;;  %v2001_v12 = vcombine.high %v1212_v8, %v1213_v9  ;;  %v2450_v17 = vld [vmem:[%s2665_s5] ss:$0 sm:$0xff] }
  0xfc   : > { %2087 = vmatprep.mubr.msk.bf16.mxu1 %vm564_vm2, %v519_v15  ;;  %v471_v21 = vadd.f32 %v2350_v42, %v470_v19  ;;  %v2070_v22 = vpop.f32.mrb[10].mxu0  ;;  %v2017_v15 = vcombine.high %v1463_v10, %v1464_v13 }
  0xfd   : > { %2088 = vmatmul.mubr.msk.bf16.gmra.mrb[4].mxu1 %vm564_vm2, %v520_v14  ;;  %v511_v25 = vmax.f32 %v479_v16, 0.0  ;;  %v482_v26 = vadd.f32 %v2070_v22, %v2350_v42  ;;  %v473_v27 = vpop.f32.mrb[11].mxu0  ;;  %v2016_v14 = vcombine.low %v1463_v10, %v1464_v13  ;;  %v1221_v10 = vld [vmem:[%s2663_s3 + $0x130] sm:$0xff] }
  0xfe   : > { %v509_v28 = vmax.f32 %v471_v21, 0.0  ;;  %v474_v29 = vadd.f32 %v2350_v42, %v473_v27  ;;  %1062 = vmatpush1.bf16.msra.mxu1 %v1988_v18  ;;  %v1214_v27 = vld [vmem:[%s2663_s3 + $0x50] sm:$0xff] }
  0xff   : > { %v512_v31 = vmax.f32 %v482_v26, 0.0  ;;  %1063 = vmatprep.subr.bf16.mxu1 %v1991_v20 }
 0x100   : > { %v510_v33 = vmax.f32 %v474_v29, 0.0 }
 0x101   : > { %v522_v36 = vpack.c.bf16 %v512_v31, %v511_v25  ;;  %v1465_v31 = vld [vmem:[%s2663_s3 + $0x58] sm:$0xff] }
 0x102   : > { %v521_v37 = vpack.c.bf16 %v510_v33, %v509_v28  ;;  %v2073_v38 = vpop.f32.mrb[12].mxu0  ;;  %1064 = vmatpush1.bf16.msra.mxu1 %v1990_v30  ;;  %v1215_v30 = vld [vmem:[%s2663_s3 + $0x70] sm:$0xff] }
 0x103   : > { %v495_v40 = vadd.f32 %v2073_v38, %v2350_v42  ;;  %v486_v41 = vpop.f32.mrb[13].mxu0  ;;  %1065 = vmatprep.subr.bf16.mxu1 %v1993_v32  ;;  %v1466_v32 = vld [vmem:[%s2663_s3 + $0x78] sm:$0xff] }
 0x104   : > { %2091 = vmatprep.mubr.msk.bf16.mxu1 %vm564_vm2, %v521_v37  ;;  %v487_v44 = vadd.f32 %v2350_v42, %v486_v41  ;;  %v2074_v45 = vpop.f32.mrb[14].mxu0  ;;  %v1217_v41 = vld [vmem:[%s2663_s3 + $0xb0] sm:$0xff] }
 0x105   : > { %2092 = vmatmul.mubr.msk.bf16.gmra.mrb[8].mxu1 %vm564_vm2, %v522_v36  ;;  %v515_v46 = vmax.f32 %v495_v40, 0.0  ;;  %v498_v47 = vadd.f32 %v2074_v45, %v2350_v42  ;;  %v489_v48 = vpop.f32.mrb[15].mxu0  ;;  %v1216_v36 = vld [vmem:[%s2663_s3 + $0x90] sm:$0xff]  ;;  %v2019_v40 = vcombine.high %v1465_v31, %v1466_v32 }
 0x106   : > { %v513_v49 = vmax.f32 %v487_v44, 0.0  ;;  %v490_v50 = vadd.f32 %v2350_v42, %v489_v48  ;;  %1066 = vmatpush1.bf16.msra.mxu1 %v1992_v39  ;;  %v723_v42 = vld [vmem:[%s2663_s3 + $0x1a0] sm:$0xff]  ;;  %v2003_v39 = vcombine.high %v1214_v27, %v1215_v30  ;;  %v1468_v44 = vld [vmem:[%s2663_s3 + $0xb8] sm:$0xff]  ;;  %v2004_v0 = vcombine.low %v1216_v36, %v1217_v41 }
 0x107   : > { %v516_v52 = vmax.f32 %v498_v47, 0.0  ;;  %1067 = vmatprep.subr.bf16.mxu1 %v1995_v43  ;;  %v1981_v58 = vcombine.high %v722_v56, %v723_v42  ;;  %v1980_v60 = vcombine.low %v722_v56, %v723_v42  ;;  %v1467_v43 = vld [vmem:[%s2663_s3 + $0x98] sm:$0xff]  ;;  %v1218_v42 = vld [vmem:[%s2663_s3 + $0xd0] sm:$0xff] }
 0x108   : > { %v514_v53 = vmax.f32 %v490_v50, 0.0  ;;  %v2002_v50 = vcombine.low %v1214_v27, %v1215_v30  ;;  %v2020_v1 = vcombine.low %v1467_v43, %v1468_v44  ;;  %v1473_v27 = vld [vmem:[%s2663_s3 + $0x158] sm:$0xff] }
 0x109   : > { %v524_v54 = vpack.c.bf16 %v516_v52, %v515_v46  ;;  %818 = vmatprep.subr.bf16.mxu0 %v1981_v58  ;;  %v1219_v58 = vld [vmem:[%s2663_s3 + $0xf0] sm:$0xff] }
 0x10a   : > { %v523_v55 = vpack.c.bf16 %v514_v53, %v513_v49  ;;  %1068 = vmatpush1.bf16.msra.mxu1 %v1994_v51  ;;  %819 = vmatpush1.bf16.msra.mxu0 %v1980_v60  ;;  %v2018_v51 = vcombine.low %v1465_v31, %v1466_v32  ;;  %v1470_v60 = vld [vmem:[%s2663_s3 + $0xf8] sm:$0xff] }
 0x10b   : > { %1069 = vmatprep.subr.bf16.mxu1 %v1997_v62  ;;  %820 = vmatprep.subr.bf16.mxu0 %v1983_v2 }
 0x10c   : > { %2095 = vmatprep.mubr.msk.bf16.mxu1 %vm564_vm2, %v523_v55  ;;  %v2021_v55 = vcombine.high %v1467_v43, %v1468_v44  ;;  %v1225_v44 = vld [vmem:[%s2663_s3 + $0x1b0] sm:$0xff] }
 0x10d   : > { %2096 = vmatmul.mubr.msk.bf16.gmra.mrb[12].mxu1 %vm564_vm2, %v524_v54  ;;  %v2005_v54 = vcombine.high %v1216_v36, %v1217_v41 }
 0x10e   : > { %1070 = vmatpush1.bf16.msra.mxu1 %v1996_v61  ;;  %821 = vmatpush1.bf16.msra.mxu0 %v1982_v4  ;;  %v2007_v4 = vcombine.high %v1218_v42, %v1219_v58 }
 0x10f   : > { %1071 = vmatprep.subr.bf16.mxu1 %v1999_v6  ;;  %1089 = vmatprep.mubr.bf16.mxu1 %v2195_v7  ;;  %v1220_v6 = vld [vmem:[%s2663_s3 + $0x110] sm:$0xff] }
 0x110   : > { %1308 = vmatprep.subr.bf16.mxu0 %v2001_v12  ;;  %v1472_v12 = vld [vmem:[%s2663_s3 + $0x138] sm:$0xff]  ;;  %v2008_v32 = vcombine.low %v1220_v6, %v1221_v10 }
 0x112   : > { %1072 = vmatpush1.bf16.msra.mxu1 %v1998_v5  ;;  %v2023_v5 = vcombine.high %v1469_v59, %v1470_v60 }
 0x113   : > { %1559 = vmatprep.subr.bf16.mxu1 %v2017_v15 }
 0x1c8   : > { %v2085_v18 = vpop.f32.mrb[0].mxu1 }
 0x1c9   : > { %v632_v16 = vadd.f32 %v2085_v18, %v2450_v17  ;;  %v623_v19 = vpop.f32.mrb[1].mxu1 }
 0x1ca   : > { %v624_v20 = vadd.f32 %v2450_v17, %v623_v19  ;;  %v2086_v21 = vpop.f32.mrb[2].mxu1  ;;  %v2006_v19 = vcombine.low %v1218_v42, %v1219_v58  ;;  %v1226_v42 = vld [vmem:[%s2663_s3 + $0x1d0] sm:$0xff] }
 0x1cb   : > { %v635_v22 = vadd.f32 %v2086_v21, %v2450_v17  ;;  %v626_v23 = vpop.f32.mrb[3].mxu1  ;;  %v688_v25 = vmax.f32 %v632_v16, 0.0  ;;  %v1227_v58 = vld [vmem:[%s2663_s3 + $0x1f0] sm:$0xff] }
 0x1cc   : > { %v627_v24 = vadd.f32 %v2450_v17, %v626_v23  ;;  %v686_v28 = vmax.f32 %v624_v20, 0.0  ;;  %v2022_v20 = vcombine.low %v1469_v59, %v1470_v60  ;;  %v1478_v59 = vld [vmem:[%s2663_s3 + $0x1f8] sm:$0xff] }
 0x1cd   : > { %v689_v26 = vmax.f32 %v635_v22, 0.0  ;;  %v2009_v22 = vcombine.high %v1220_v6, %v1221_v10 }
 0x1ce   : > { %v687_v29 = vmax.f32 %v627_v24, 0.0  ;;  %v1222_v24 = vld [vmem:[%s2663_s3 + $0x150] sm:$0xff] }
 0x1cf   : > { %v2468_v33 = vpack.c.bf16 %v689_v26, %v688_v25  ;;  %v1223_v26 = vld [vmem:[%s2663_s3 + $0x170] sm:$0xff] }
 0x1d0   : > { %v2470_v34 = vpack.c.bf16 %v687_v29, %v686_v28  ;;  %v2089_v35 = vpop.f32.mrb[4].mxu1  ;;  %v1474_v28 = vld [vmem:[%s2663_s3 + $0x178] sm:$0xff] }
 0x1d1   : > { %v648_v37 = vadd.f32 %v2089_v35, %v2450_v17  ;;  %v639_v38 = vpop.f32.mrb[5].mxu1 }
 0x1d2   : > { %v640_v45 = vadd.f32 %v2450_v17, %v639_v38  ;;  %839 = vmatmul.mubr.bf16.vlgmr.msra.gmra.mrb[16].mxu0 %v2470_v34  ;;  %1090 = vmatmul.mubr.bf16.vlgmr.msra.gmra.mrb[16].mxu1 %v2470_v34  ;;  %v2090_v46 = vpop.f32.mrb[6].mxu1  ;;  %v2011_v38 = vcombine.high %v1222_v24, %v1223_v26 }
 0x1d3   : > { %v692_v47 = vmax.f32 %v648_v37, 0.0  ;;  %1309 = vmatpush1.bf16.msra.mxu0 %v2000_v11  ;;  %1560 = vmatpush1.bf16.msra.mxu1 %v2016_v14  ;;  %v651_v48 = vadd.f32 %v2090_v46, %v2450_v17  ;;  %v642_v49 = vpop.f32.mrb[7].mxu1  ;;  %v1471_v11 = vld [vmem:[%s2663_s3 + $0x118] sm:$0xff] }
 0x1d4   : > { %v690_v52 = vmax.f32 %v640_v45, 0.0  ;;  %v643_v53 = vadd.f32 %v2450_v17, %v642_v49  ;;  %848 = vmatprep.mubr.bf16.mxu0 %v2195_v7  ;;  %1099 = vmatprep.mubr.bf16.mxu1 %v2195_v7  ;;  %v2025_v23 = vcombine.high %v1471_v11, %v1472_v12  ;;  %v2024_v35 = vcombine.low %v1471_v11, %v1472_v12  ;;  %v1475_v45 = vld [vmem:[%s2663_s3 + $0x198] sm:$0xff] }
 0x1d5   : > { %v693_v56 = vmax.f32 %v651_v48, 0.0  ;;  %1310 = vmatprep.subr.bf16.mxu0 %v2003_v39  ;;  %1561 = vmatprep.subr.bf16.mxu1 %v2019_v40  ;;  %v2027_v39 = vcombine.high %v1473_v27, %v1474_v28  ;;  %v1224_v40 = vld [vmem:[%s2663_s3 + $0x190] sm:$0xff]  ;;  %v1476_v46 = vld [vmem:[%s2663_s3 + $0x1b8] sm:$0xff] }
 0x1d6   : > { %v691_v57 = vmax.f32 %v643_v53, 0.0  ;;  %v2026_v53 = vcombine.low %v1473_v27, %v1474_v28 }
 0x1d7   : > { %v2504_v61 = vpack.c.bf16 %v693_v56, %v692_v47  ;;  %1311 = vmatpush1.bf16.msra.mxu0 %v2002_v50  ;;  %1562 = vmatpush1.bf16.msra.mxu1 %v2018_v51  ;;  %v2029_v56 = vcombine.high %v1475_v45, %v1476_v46 }
 0x1d8   : > { %v2506_v62 = vpack.c.bf16 %v691_v57, %v690_v52  ;;  %v2093_v63 = vpop.f32.mrb[8].mxu1  ;;  %1312 = vmatprep.subr.bf16.mxu0 %v2005_v54  ;;  %1563 = vmatprep.subr.bf16.mxu1 %v2021_v55  ;;  %v2010_v52 = vcombine.low %v1222_v24, %v1223_v26  ;;  %v2013_v55 = vcombine.high %v1224_v40, %v1225_v44 }
 0x1d9   : > { %v664_v2 = vadd.f32 %v2093_v63, %v2450_v17  ;;  %v655_v3 = vpop.f32.mrb[9].mxu1 }
 0x1da   : > { %849 = vmatmul.mubr.bf16.gmra.mrb[20].mxu0 %v2468_v33  ;;  %1100 = vmatmul.mubr.bf16.gmra.mrb[20].mxu1 %v2468_v33  ;;  %v656_v8 = vadd.f32 %v2450_v17, %v655_v3  ;;  %v2094_v9 = vpop.f32.mrb[10].mxu1 }
 0x1db   : > { %v696_v13 = vmax.f32 %v664_v2, 0.0  ;;  %858 = vmatprep.mubr.bf16.mxu0 %v2195_v7  ;;  %1109 = vmatprep.mubr.bf16.mxu1 %v2195_v7  ;;  %v667_v14 = vadd.f32 %v2094_v9, %v2450_v17  ;;  %v658_v15 = vpop.f32.mrb[11].mxu1  ;;  %v2015_v2 = vcombine.high %v1226_v42, %v1227_v58 }
 0x1dc   : > { %v694_v18 = vmax.f32 %v656_v8, 0.0  ;;  %1313 = vmatpush1.bf16.msra.mxu0 %v2004_v0  ;;  %1564 = vmatpush1.bf16.msra.mxu1 %v2020_v1  ;;  %v659_v16 = vadd.f32 %v2450_v17, %v658_v15  ;;  %v2012_v0 = vcombine.low %v1224_v40, %v1225_v44  ;;  %v2028_v1 = vcombine.low %v1475_v45, %v1476_v46 }
 0x1dd   : > { %v697_v21 = vmax.f32 %v667_v14, 0.0  ;;  %1314 = vmatprep.subr.bf16.mxu0 %v2007_v4  ;;  %1565 = vmatprep.subr.bf16.mxu1 %v2023_v5  ;;  %v2014_v4 = vcombine.low %v1226_v42, %v1227_v58 }
 0x1de   : > { %v695_v25 = vmax.f32 %v659_v16, 0.0 }
 0x1df   : > { %v2540_v29 = vpack.c.bf16 %v697_v21, %v696_v13 }
 0x1e0   : > { %v2542_v30 = vpack.c.bf16 %v695_v25, %v694_v18  ;;  %1315 = vmatpush1.bf16.msra.mxu0 %v2006_v19  ;;  %1566 = vmatpush1.bf16.msra.mxu1 %v2022_v20  ;;  %v2097_v31 = vpop.f32.mrb[12].mxu1 }
 0x1e1   : > { %v680_v36 = vadd.f32 %v2097_v31, %v2450_v17  ;;  %1316 = vmatprep.subr.bf16.mxu0 %v2009_v22  ;;  %1567 = vmatprep.subr.bf16.mxu1 %v2025_v23  ;;  %v671_v37 = vpop.f32.mrb[13].mxu1 }
 0x1e2   : > { %859 = vmatmul.mubr.bf16.gmra.mrb[24].mxu0 %v2506_v62  ;;  %1110 = vmatmul.mubr.bf16.gmra.mrb[24].mxu1 %v2506_v62  ;;  %v672_v41 = vadd.f32 %v2450_v17, %v671_v37  ;;  %v2098_v43 = vpop.f32.mrb[14].mxu1 }
 0x1e3   : > { %868 = vmatprep.mubr.bf16.mxu0 %v2195_v7  ;;  %1119 = vmatprep.mubr.bf16.mxu1 %v2195_v7  ;;  %v700_v47 = vmax.f32 %v680_v36, 0.0  ;;  %v683_v48 = vadd.f32 %v2098_v43, %v2450_v17  ;;  %v674_v49 = vpop.f32.mrb[15].mxu1 }
 0x1e4   : > { %v698_v50 = vmax.f32 %v672_v41, 0.0  ;;  %1317 = vmatpush1.bf16.msra.mxu0 %v2008_v32  ;;  %1568 = vmatpush1.bf16.msra.mxu1 %v2024_v35  ;;  %v675_v51 = vadd.f32 %v2450_v17, %v674_v49  ;;  %v1477_v17 = vld [vmem:[%s2663_s3 + $0x1d8] sm:$0xff] }
 0x1e5   : > { %v701_v54 = vmax.f32 %v683_v48, 0.0  ;;  %1318 = vmatprep.subr.bf16.mxu0 %v2011_v38  ;;  %1569 = vmatprep.subr.bf16.mxu1 %v2027_v39  ;;  %v2031_v3 = vcombine.high %v1477_v17, %v1478_v59  ;;  %v2030_v5 = vcombine.low %v1477_v17, %v1478_v59 }
 0x1e6   : > { %v699_v57 = vmax.f32 %v675_v51, 0.0 }
 0x1e7   : > { %v2576_v60 = vpack.c.bf16 %v701_v54, %v700_v47 }
 0x1e8   : > { %v708_v63 = vpack.c.bf16 %v699_v57, %v698_v50  ;;  %1319 = vmatpush1.bf16.msra.mxu0 %v2010_v52  ;;  %1570 = vmatpush1.bf16.msra.mxu1 %v2026_v53 }
 0x1e9   : > { %1320 = vmatprep.subr.bf16.mxu0 %v2013_v55  ;;  %1571 = vmatprep.subr.bf16.mxu1 %v2029_v56 }
 0x1ea   : > { %869 = vmatmul.mubr.bf16.gmra.mrb[28].mxu0 %v2504_v61  ;;  %1120 = vmatmul.mubr.bf16.gmra.mrb[28].mxu1 %v2504_v61 }
 0x1eb   : > { %878 = vmatprep.mubr.bf16.mxu0 %v2195_v7  ;;  %1129 = vmatprep.mubr.bf16.mxu1 %v2195_v7 }
 0x1ec   : > { %1321 = vmatpush1.bf16.msra.mxu0 %v2012_v0  ;;  %1572 = vmatpush1.bf16.msra.mxu1 %v2028_v1 }
 0x1ed   : > { %1322 = vmatprep.subr.bf16.mxu0 %v2015_v2  ;;  %1573 = vmatprep.subr.bf16.mxu1 %v2031_v3 }
 0x1f0   : > { %1323 = vmatpush1.bf16.msra.mxu0 %v2014_v4  ;;  %1574 = vmatpush1.bf16.msra.mxu1 %v2030_v5 }
 0x1f2   : > { %879 = vmatmul.mubr.bf16.gmra.mrb[32].mxu0 %v2542_v30  ;;  %1130 = vmatmul.mubr.bf16.gmra.mrb[32].mxu1 %v2542_v30 }
 0x1f3   : > { %888 = vmatprep.mubr.bf16.mxu0 %v2195_v7  ;;  %1139 = vmatprep.mubr.bf16.mxu1 %v2195_v7 }
 0x1fa   : > { %889 = vmatmul.mubr.bf16.gmra.mrb[36].mxu0 %v2540_v29  ;;  %1140 = vmatmul.mubr.bf16.gmra.mrb[36].mxu1 %v2540_v29 }
 0x1fb   : > { %898 = vmatprep.mubr.bf16.mxu0 %v2195_v7  ;;  %1149 = vmatprep.mubr.bf16.mxu1 %v2195_v7 }
 0x202   : > { %899 = vmatmul.mubr.bf16.gmra.mrb[40].mxu0 %v708_v63  ;;  %1150 = vmatmul.mubr.bf16.gmra.mrb[40].mxu1 %v708_v63 }
 0x203   : > { %908 = vmatprep.mubr.bf16.mxu0 %v2195_v7  ;;  %1159 = vmatprep.mubr.bf16.mxu1 %v2195_v7 }
 0x20a   : > { %909 = vmatmul.mubr.bf16.gmra.mrb[44].mxu0 %v2576_v60  ;;  %1160 = vmatmul.mubr.bf16.gmra.mrb[44].mxu1 %v2576_v60 }
 0x20b   : > { %1340 = vmatprep.mubr.bf16.mxu0 %v2195_v7  ;;  %1591 = vmatprep.mubr.bf16.mxu1 %v2195_v7 }
 0x212   : > { %1341 = vmatmul.mubr.bf16.vlgmr.msra.gmra.mrb[48].mxu0 %v2470_v34  ;;  %1592 = vmatmul.mubr.bf16.vlgmr.msra.gmra.mrb[48].mxu1 %v2470_v34 }
 0x213   : > { %1350 = vmatprep.mubr.bf16.mxu0 %v2195_v7  ;;  %1601 = vmatprep.mubr.bf16.mxu1 %v2195_v7 }
 0x21a   : > { %1351 = vmatmul.mubr.bf16.gmra.mrb[52].mxu0 %v2468_v33  ;;  %1602 = vmatmul.mubr.bf16.gmra.mrb[52].mxu1 %v2468_v33 }
 0x21b   : > { %1360 = vmatprep.mubr.bf16.mxu0 %v2195_v7  ;;  %1611 = vmatprep.mubr.bf16.mxu1 %v2195_v7 }
 0x222   : > { %1361 = vmatmul.mubr.bf16.gmra.mrb[56].mxu0 %v2506_v62  ;;  %1612 = vmatmul.mubr.bf16.gmra.mrb[56].mxu1 %v2506_v62 }
 0x223   : > { %1370 = vmatprep.mubr.bf16.mxu0 %v2195_v7  ;;  %1621 = vmatprep.mubr.bf16.mxu1 %v2195_v7 }
 0x22a   : > { %1371 = vmatmul.mubr.bf16.gmra.mrb[60].mxu0 %v2504_v61  ;;  %1622 = vmatmul.mubr.bf16.gmra.mrb[60].mxu1 %v2504_v61 }
 0x22b   : > { %1380 = vmatprep.mubr.bf16.mxu0 %v2195_v7  ;;  %1631 = vmatprep.mubr.bf16.mxu1 %v2195_v7 }
 0x232   : > { %1381 = vmatmul.mubr.bf16.gmra.mrb[64].mxu0 %v2542_v30  ;;  %1632 = vmatmul.mubr.bf16.gmra.mrb[64].mxu1 %v2542_v30 }
 0x233   : > { %1390 = vmatprep.mubr.bf16.mxu0 %v2195_v7  ;;  %1641 = vmatprep.mubr.bf16.mxu1 %v2195_v7 }
 0x23a   : > { %1391 = vmatmul.mubr.bf16.gmra.mrb[68].mxu0 %v2540_v29  ;;  %1642 = vmatmul.mubr.bf16.gmra.mrb[68].mxu1 %v2540_v29 }
 0x23b   : > { %1400 = vmatprep.mubr.bf16.mxu0 %v2195_v7  ;;  %1651 = vmatprep.mubr.bf16.mxu1 %v2195_v7 }
 0x242   : > { %1401 = vmatmul.mubr.bf16.gmra.mrb[72].mxu0 %v708_v63  ;;  %1652 = vmatmul.mubr.bf16.gmra.mrb[72].mxu1 %v708_v63 }
 0x243   : > { %1410 = vmatprep.mubr.bf16.mxu0 %v2195_v7  ;;  %1661 = vmatprep.mubr.bf16.mxu1 %v2195_v7 }
 0x24a   : > { %1411 = vmatmul.mubr.bf16.gmra.mrb[76].mxu0 %v2576_v60  ;;  %1662 = vmatmul.mubr.bf16.gmra.mrb[76].mxu1 %v2576_v60 }
 0x2a5   : > { %v840_v33 = vpop.f32.mrb[16].mxu0  ;;  %v1091_v34 = vpop.f32.mrb[16].mxu1 }
 0x2a6   : > { %v842_v61 = vpop.f32.mrb[17].mxu0  ;;  %v1093_v62 = vpop.f32.mrb[17].mxu1 }
 0x2a7   : > { %v844_v6 = vpop.f32.mrb[18].mxu0  ;;  %v1095_v8 = vpop.f32.mrb[18].mxu1 }
 0x2a8   : > { %v846_v9 = vpop.f32.mrb[19].mxu0  ;;  %v1097_v10 = vpop.f32.mrb[19].mxu1 }
 0x2ad   : > { %v850_v11 = vpop.f32.mrb[20].mxu0  ;;  %v1101_v12 = vpop.f32.mrb[20].mxu1 }
 0x2ae   : > { %v919_v13 = vmax.f32 %v840_v33, %v850_v11  ;;  %v1170_v14 = vmax.f32 %v1091_v34, %v1101_v12  ;;  %v852_v15 = vpop.f32.mrb[21].mxu0  ;;  %v1103_v18 = vpop.f32.mrb[21].mxu1 }
 0x2af   : > { %v940_v16 = vmax.f32 %v842_v61, %v852_v15  ;;  %v1191_v7 = vmax.f32 %v1093_v62, %v1103_v18  ;;  %v854_v19 = vpop.f32.mrb[22].mxu0  ;;  %v1105_v20 = vpop.f32.mrb[22].mxu1 }
 0x2b0   : > { %v920_v21 = vmax.f32 %v844_v6, %v854_v19  ;;  %v1171_v22 = vmax.f32 %v1095_v8, %v1105_v20  ;;  %v856_v23 = vpop.f32.mrb[23].mxu0  ;;  %v1107_v24 = vpop.f32.mrb[23].mxu1 }
 0x2b1   : > { %v941_v25 = vmax.f32 %v846_v9, %v856_v23  ;;  %v1192_v26 = vmax.f32 %v1097_v10, %v1107_v24 }
 0x2b5   : > { %v860_v27 = vpop.f32.mrb[24].mxu0  ;;  %v1111_v28 = vpop.f32.mrb[24].mxu1 }
 0x2b6   : > { %v921_v29 = vmax.f32 %v919_v13, %v860_v27  ;;  %v1172_v30 = vmax.f32 %v1170_v14, %v1111_v28  ;;  %v862_v31 = vpop.f32.mrb[25].mxu0  ;;  %v1113_v32 = vpop.f32.mrb[25].mxu1 }
 0x2b7   : > { %v942_v35 = vmax.f32 %v940_v16, %v862_v31  ;;  %v1193_v36 = vmax.f32 %v1191_v7, %v1113_v32  ;;  %v864_v37 = vpop.f32.mrb[26].mxu0  ;;  %v1115_v38 = vpop.f32.mrb[26].mxu1 }
 0x2b8   : > { %v922_v39 = vmax.f32 %v920_v21, %v864_v37  ;;  %v1173_v40 = vmax.f32 %v1171_v22, %v1115_v38  ;;  %v866_v41 = vpop.f32.mrb[27].mxu0  ;;  %v1117_v43 = vpop.f32.mrb[27].mxu1 }
 0x2b9   : > { %v943_v44 = vmax.f32 %v941_v25, %v866_v41  ;;  %v1194_v45 = vmax.f32 %v1192_v26, %v1117_v43 }
 0x2bd   : > { %v870_v46 = vpop.f32.mrb[28].mxu0  ;;  %v1121_v47 = vpop.f32.mrb[28].mxu1 }
 0x2be   : > { %v923_v48 = vmax.f32 %v921_v29, %v870_v46  ;;  %v1174_v49 = vmax.f32 %v1172_v30, %v1121_v47  ;;  %v872_v50 = vpop.f32.mrb[29].mxu0  ;;  %v1123_v51 = vpop.f32.mrb[29].mxu1 }
 0x2bf   : > { %v944_v52 = vmax.f32 %v942_v35, %v872_v50  ;;  %v1195_v53 = vmax.f32 %v1193_v36, %v1123_v51  ;;  %v874_v54 = vpop.f32.mrb[30].mxu0  ;;  %v1125_v55 = vpop.f32.mrb[30].mxu1 }
 0x2c0   : > { %v924_v56 = vmax.f32 %v922_v39, %v874_v54  ;;  %v1175_v42 = vmax.f32 %v1173_v40, %v1125_v55  ;;  %v876_v57 = vpop.f32.mrb[31].mxu0  ;;  %v1127_v58 = vpop.f32.mrb[31].mxu1 }
 0x2c1   : > { %v945_v17 = vmax.f32 %v943_v44, %v876_v57  ;;  %v1196_v59 = vmax.f32 %v1194_v45, %v1127_v58 }
 0x2c5   : > { %v880_v60 = vpop.f32.mrb[32].mxu0  ;;  %v1131_v63 = vpop.f32.mrb[32].mxu1 }
 0x2c6   : > { %v925_v0 = vmax.f32 %v923_v48, %v880_v60  ;;  %v1176_v1 = vmax.f32 %v1174_v49, %v1131_v63  ;;  %v882_v2 = vpop.f32.mrb[33].mxu0  ;;  %v1133_v3 = vpop.f32.mrb[33].mxu1 }
 0x2c7   : > { %v946_v4 = vmax.f32 %v944_v52, %v882_v2  ;;  %v1197_v5 = vmax.f32 %v1195_v53, %v1133_v3  ;;  %v884_v33 = vpop.f32.mrb[34].mxu0  ;;  %v1135_v34 = vpop.f32.mrb[34].mxu1 }
 0x2c8   : > { %v926_v61 = vmax.f32 %v924_v56, %v884_v33  ;;  %v1177_v62 = vmax.f32 %v1175_v42, %v1135_v34  ;;  %v886_v6 = vpop.f32.mrb[35].mxu0  ;;  %v1137_v8 = vpop.f32.mrb[35].mxu1 }
 0x2c9   : > { %v947_v9 = vmax.f32 %v945_v17, %v886_v6  ;;  %v1198_v10 = vmax.f32 %v1196_v59, %v1137_v8 }
 0x2cd   : > { %v890_v11 = vpop.f32.mrb[36].mxu0  ;;  %v1141_v12 = vpop.f32.mrb[36].mxu1 }
 0x2ce   : > { %v927_v13 = vmax.f32 %v925_v0, %v890_v11  ;;  %v1178_v14 = vmax.f32 %v1176_v1, %v1141_v12  ;;  %v892_v15 = vpop.f32.mrb[37].mxu0  ;;  %v1143_v18 = vpop.f32.mrb[37].mxu1 }
 0x2cf   : > { %v948_v16 = vmax.f32 %v946_v4, %v892_v15  ;;  %v1199_v7 = vmax.f32 %v1197_v5, %v1143_v18  ;;  %v894_v19 = vpop.f32.mrb[38].mxu0  ;;  %v1145_v20 = vpop.f32.mrb[38].mxu1 }
 0x2d0   : > { %v928_v21 = vmax.f32 %v926_v61, %v894_v19  ;;  %v1179_v22 = vmax.f32 %v1177_v62, %v1145_v20  ;;  %v896_v23 = vpop.f32.mrb[39].mxu0  ;;  %v1147_v24 = vpop.f32.mrb[39].mxu1 }
 0x2d1   : > { %v949_v25 = vmax.f32 %v947_v9, %v896_v23  ;;  %v1200_v26 = vmax.f32 %v1198_v10, %v1147_v24 }
 0x2d5   : > { %v900_v27 = vpop.f32.mrb[40].mxu0  ;;  %v1151_v28 = vpop.f32.mrb[40].mxu1 }
 0x2d6   : > { %v929_v29 = vmax.f32 %v927_v13, %v900_v27  ;;  %v1180_v30 = vmax.f32 %v1178_v14, %v1151_v28  ;;  %v902_v31 = vpop.f32.mrb[41].mxu0  ;;  %v1153_v32 = vpop.f32.mrb[41].mxu1 }
 0x2d7   : > { %v950_v35 = vmax.f32 %v948_v16, %v902_v31  ;;  %v1201_v36 = vmax.f32 %v1199_v7, %v1153_v32  ;;  %v904_v37 = vpop.f32.mrb[42].mxu0  ;;  %v1155_v38 = vpop.f32.mrb[42].mxu1 }
 0x2d8   : > { %v930_v39 = vmax.f32 %v928_v21, %v904_v37  ;;  %v1181_v40 = vmax.f32 %v1179_v22, %v1155_v38  ;;  %v906_v41 = vpop.f32.mrb[43].mxu0  ;;  %v1157_v43 = vpop.f32.mrb[43].mxu1 }
 0x2d9   : > { %v951_v44 = vmax.f32 %v949_v25, %v906_v41  ;;  %v1202_v45 = vmax.f32 %v1200_v26, %v1157_v43 }
 0x2dd   : > { %v910_v46 = vpop.f32.mrb[44].mxu0  ;;  %v1161_v47 = vpop.f32.mrb[44].mxu1 }
 0x2de   : > { %v931_v48 = vmax.f32 %v929_v29, %v910_v46  ;;  %v1182_v49 = vmax.f32 %v1180_v30, %v1161_v47  ;;  %v912_v50 = vpop.f32.mrb[45].mxu0  ;;  %v1163_v51 = vpop.f32.mrb[45].mxu1 }
 0x2df   : > { %v952_v52 = vmax.f32 %v950_v35, %v912_v50  ;;  %v1203_v53 = vmax.f32 %v1201_v36, %v1163_v51  ;;  %v914_v54 = vpop.f32.mrb[46].mxu0  ;;  %v1165_v55 = vpop.f32.mrb[46].mxu1 }
 0x2e0   : > { %v932_v56 = vmax.f32 %v930_v39, %v914_v54  ;;  %v1183_v42 = vmax.f32 %v1181_v40, %v1165_v55  ;;  %v916_v57 = vpop.f32.mrb[47].mxu0  ;;  %v1167_v58 = vpop.f32.mrb[47].mxu1 }
 0x2e1   : > { %v953_v17 = vmax.f32 %v951_v44, %v916_v57  ;;  %v1204_v59 = vmax.f32 %v1202_v45, %v1167_v58 }
 0x2e2   : > { %v933_v60 = vmax.f32 %v931_v48, %v932_v56  ;;  %v1184_v63 = vmax.f32 %v1182_v49, %v1183_v42 }
 0x2e3   : > { %v954_v0 = vmax.f32 %v952_v52, %v953_v17  ;;  %v1205_v1 = vmax.f32 %v1203_v53, %v1204_v59 }
 0x2e4   : > { %v934_v2 = vrot.slane %v933_v60, 4  ;;  %v1185_v3 = vrot.slane %v1184_v63, 4 }
 0x2e5   : > { %v955_v4 = vrot.slane %v954_v0, 4  ;;  %v1206_v5 = vrot.slane %v1205_v1, 4  ;;  %v1342_v33 = vpop.f32.mrb[48].mxu0  ;;  %v1593_v34 = vpop.f32.mrb[48].mxu1 }
 0x2e6   : > { %v935_v61 = vmax.f32 %v933_v60, %v934_v2  ;;  %v1186_v62 = vmax.f32 %v1184_v63, %v1185_v3  ;;  %v1344_v6 = vpop.f32.mrb[49].mxu0  ;;  %v1595_v8 = vpop.f32.mrb[49].mxu1 }
 0x2e7   : > { %v956_v9 = vmax.f32 %v954_v0, %v955_v4  ;;  %v1207_v10 = vmax.f32 %v1205_v1, %v1206_v5  ;;  %v1346_v11 = vpop.f32.mrb[50].mxu0  ;;  %v1597_v12 = vpop.f32.mrb[50].mxu1 }
 0x2e8   : > { %v936_v13 = vrot.slane %v935_v61, 2  ;;  %v1187_v14 = vrot.slane %v1186_v62, 2  ;;  %v1348_v15 = vpop.f32.mrb[51].mxu0  ;;  %v1599_v18 = vpop.f32.mrb[51].mxu1 }
 0x2e9   : > { %v957_v16 = vrot.slane %v956_v9, 2  ;;  %v1208_v7 = vrot.slane %v1207_v10, 2 }
 0x2ea   : > { %v937_v19 = vmax.f32 %v935_v61, %v936_v13  ;;  %v1188_v20 = vmax.f32 %v1186_v62, %v1187_v14 }
 0x2eb   : > { %v958_v21 = vmax.f32 %v956_v9, %v957_v16  ;;  %v1209_v22 = vmax.f32 %v1207_v10, %v1208_v7 }
 0x2ec   : > { %v938_v23 = vrot.slane %v937_v19, 1  ;;  %v1189_v24 = vrot.slane %v1188_v20, 1 }
 0x2ed   : > { %v959_v25 = vrot.slane %v958_v21, 1  ;;  %v1210_v26 = vrot.slane %v1209_v22, 1  ;;  %v1352_v27 = vpop.f32.mrb[52].mxu0  ;;  %v1603_v28 = vpop.f32.mrb[52].mxu1 }
 0x2ee   : > { %v2624_v29 = vmax.f32 %v937_v19, %v938_v23  ;;  %v2626_v30 = vmax.f32 %v1188_v20, %v1189_v24  ;;  %v1421_v31 = vmax.f32 %v1342_v33, %v1352_v27  ;;  %v1672_v32 = vmax.f32 %v1593_v34, %v1603_v28  ;;  %v1354_v35 = vpop.f32.mrb[53].mxu0  ;;  %v1605_v36 = vpop.f32.mrb[53].mxu1 }
 0x2ef   : > { %v2628_v37 = vmax.f32 %v958_v21, %v959_v25  ;;  %v2630_v38 = vmax.f32 %v1209_v22, %v1210_v26  ;;  %v1442_v39 = vmax.f32 %v1344_v6, %v1354_v35  ;;  %v1693_v40 = vmax.f32 %v1595_v8, %v1605_v36  ;;  %v1356_v41 = vpop.f32.mrb[54].mxu0  ;;  %v1607_v43 = vpop.f32.mrb[54].mxu1 }
 0x2f0   : > { %v1422_v44 = vmax.f32 %v1346_v11, %v1356_v41  ;;  %v1673_v45 = vmax.f32 %v1597_v12, %v1607_v43  ;;  %v1358_v46 = vpop.f32.mrb[55].mxu0  ;;  %v1609_v47 = vpop.f32.mrb[55].mxu1 }
 0x2f1   : > { %v1443_v48 = vmax.f32 %v1348_v15, %v1358_v46  ;;  %v1694_v49 = vmax.f32 %v1599_v18, %v1609_v47 }
 0x2f5   : > { %v1362_v50 = vpop.f32.mrb[56].mxu0  ;;  %v1613_v51 = vpop.f32.mrb[56].mxu1 }
 0x2f6   : > { %v1423_v52 = vmax.f32 %v1421_v31, %v1362_v50  ;;  %v1674_v53 = vmax.f32 %v1672_v32, %v1613_v51  ;;  %v1364_v54 = vpop.f32.mrb[57].mxu0  ;;  %v1615_v55 = vpop.f32.mrb[57].mxu1 }
 0x2f7   : > { %v1444_v56 = vmax.f32 %v1442_v39, %v1364_v54  ;;  %v1695_v42 = vmax.f32 %v1693_v40, %v1615_v55  ;;  %v1366_v57 = vpop.f32.mrb[58].mxu0  ;;  %v1617_v58 = vpop.f32.mrb[58].mxu1 }
 0x2f8   : > { %v1424_v17 = vmax.f32 %v1422_v44, %v1366_v57  ;;  %v1675_v59 = vmax.f32 %v1673_v45, %v1617_v58  ;;  %v1368_v60 = vpop.f32.mrb[59].mxu0  ;;  %v1619_v63 = vpop.f32.mrb[59].mxu1 }
 0x2f9   : > { %v1445_v0 = vmax.f32 %v1443_v48, %v1368_v60  ;;  %v1696_v1 = vmax.f32 %v1694_v49, %v1619_v63 }
 0x2fd   : > { %v1372_v2 = vpop.f32.mrb[60].mxu0  ;;  %v1623_v3 = vpop.f32.mrb[60].mxu1 }
 0x2fe   : > { %v1425_v4 = vmax.f32 %v1423_v52, %v1372_v2  ;;  %v1676_v5 = vmax.f32 %v1674_v53, %v1623_v3  ;;  %v1374_v33 = vpop.f32.mrb[61].mxu0  ;;  %v1625_v34 = vpop.f32.mrb[61].mxu1 }
 0x2ff   : > { %v1446_v61 = vmax.f32 %v1444_v56, %v1374_v33  ;;  %v1697_v62 = vmax.f32 %v1695_v42, %v1625_v34  ;;  %v1376_v6 = vpop.f32.mrb[62].mxu0  ;;  %v1627_v8 = vpop.f32.mrb[62].mxu1 }
 0x300   : > { %v1426_v9 = vmax.f32 %v1424_v17, %v1376_v6  ;;  %v1677_v10 = vmax.f32 %v1675_v59, %v1627_v8  ;;  %v1378_v11 = vpop.f32.mrb[63].mxu0  ;;  %v1629_v12 = vpop.f32.mrb[63].mxu1 }
 0x301   : > { %v1447_v13 = vmax.f32 %v1445_v0, %v1378_v11  ;;  %v1698_v14 = vmax.f32 %v1696_v1, %v1629_v12 }
 0x305   : > { %v1382_v15 = vpop.f32.mrb[64].mxu0  ;;  %v1633_v18 = vpop.f32.mrb[64].mxu1 }
 0x306   : > { %v1427_v16 = vmax.f32 %v1425_v4, %v1382_v15  ;;  %v1678_v7 = vmax.f32 %v1676_v5, %v1633_v18  ;;  %v1384_v19 = vpop.f32.mrb[65].mxu0  ;;  %v1635_v20 = vpop.f32.mrb[65].mxu1 }
 0x307   : > { %v1448_v21 = vmax.f32 %v1446_v61, %v1384_v19  ;;  %v1699_v22 = vmax.f32 %v1697_v62, %v1635_v20  ;;  %v1386_v23 = vpop.f32.mrb[66].mxu0  ;;  %v1637_v24 = vpop.f32.mrb[66].mxu1 }
 0x308   : > { %v1428_v25 = vmax.f32 %v1426_v9, %v1386_v23  ;;  %v1679_v26 = vmax.f32 %v1677_v10, %v1637_v24  ;;  %v1388_v27 = vpop.f32.mrb[67].mxu0  ;;  %v1639_v28 = vpop.f32.mrb[67].mxu1 }
 0x309   : > { %v1449_v31 = vmax.f32 %v1447_v13, %v1388_v27  ;;  %v1700_v32 = vmax.f32 %v1698_v14, %v1639_v28 }
 0x30d   : > { %v1392_v35 = vpop.f32.mrb[68].mxu0  ;;  %v1643_v36 = vpop.f32.mrb[68].mxu1 }
 0x30e   : > { %v1429_v39 = vmax.f32 %v1427_v16, %v1392_v35  ;;  %v1680_v40 = vmax.f32 %v1678_v7, %v1643_v36  ;;  %v1394_v41 = vpop.f32.mrb[69].mxu0  ;;  %v1645_v43 = vpop.f32.mrb[69].mxu1 }
 0x30f   : > { %v1450_v44 = vmax.f32 %v1448_v21, %v1394_v41  ;;  %v1701_v45 = vmax.f32 %v1699_v22, %v1645_v43  ;;  %v1396_v46 = vpop.f32.mrb[70].mxu0  ;;  %v1647_v47 = vpop.f32.mrb[70].mxu1 }
 0x310   : > { %v1430_v48 = vmax.f32 %v1428_v25, %v1396_v46  ;;  %v1681_v49 = vmax.f32 %v1679_v26, %v1647_v47  ;;  %v1398_v50 = vpop.f32.mrb[71].mxu0  ;;  %v1649_v51 = vpop.f32.mrb[71].mxu1 }
 0x311   : > { %v1451_v52 = vmax.f32 %v1449_v31, %v1398_v50  ;;  %v1702_v53 = vmax.f32 %v1700_v32, %v1649_v51 }
 0x315   : > { %v1402_v54 = vpop.f32.mrb[72].mxu0  ;;  %v1653_v55 = vpop.f32.mrb[72].mxu1 }
 0x316   : > { %v1431_v56 = vmax.f32 %v1429_v39, %v1402_v54  ;;  %v1682_v42 = vmax.f32 %v1680_v40, %v1653_v55  ;;  %v1404_v57 = vpop.f32.mrb[73].mxu0  ;;  %v1655_v58 = vpop.f32.mrb[73].mxu1  ;;  %v1733_v54 = vlaneseq (!%p2032_p7)  ;;  %v2196_v55 = vmov (!%p2032_p7), 1966171168  }
 0x317   : > { %v1452_v17 = vmax.f32 %v1450_v44, %v1404_v57  ;;  %v1703_v59 = vmax.f32 %v1701_v45, %v1655_v58  ;;  %v1406_v60 = vpop.f32.mrb[74].mxu0  ;;  %v1657_v63 = vpop.f32.mrb[74].mxu1  ;;  %v1727_v58 = vcombine.low (!%p2032_p7), %v2626_v30, %v2630_v38 }
 0x318   : > { %v1432_v0 = vmax.f32 %v1430_v48, %v1406_v60  ;;  %v1683_v1 = vmax.f32 %v1681_v49, %v1657_v63  ;;  %v1408_v2 = vpop.f32.mrb[75].mxu0  ;;  %v1659_v3 = vpop.f32.mrb[75].mxu1  ;;  %v1734_v57 = vshrl.u32 (!%p2032_p7), %v1733_v54, 7 }
 0x319   : > { %v1453_v4 = vmax.f32 %v1451_v52, %v1408_v2  ;;  %v1704_v5 = vmax.f32 %v1702_v53, %v1659_v3 }
 0x31d   : > { %v1412_v33 = vpop.f32.mrb[76].mxu0  ;;  %v1663_v34 = vpop.f32.mrb[76].mxu1 }
 0x31e   : > { %v1433_v61 = vmax.f32 %v1431_v56, %v1412_v33  ;;  %v1684_v62 = vmax.f32 %v1682_v42, %v1663_v34  ;;  %v1414_v6 = vpop.f32.mrb[77].mxu0  ;;  %v1665_v8 = vpop.f32.mrb[77].mxu1  ;;  %v1731_v56 = vunpack.c.l.s4 (!%p2032_p7), %v2196_v55  ;;  %v1726_v42 = vcombine.low (!%p2032_p7), %v2624_v29, %v2628_v37 }
 0x31f   : > { %v1454_v9 = vmax.f32 %v1452_v17, %v1414_v6  ;;  %v1705_v10 = vmax.f32 %v1703_v59, %v1665_v8  ;;  %v1416_v11 = vpop.f32.mrb[78].mxu0  ;;  %v1667_v12 = vpop.f32.mrb[78].mxu1 }
 0x320   : > { %v1434_v13 = vmax.f32 %v1432_v0, %v1416_v11  ;;  %v1685_v14 = vmax.f32 %v1683_v1, %v1667_v12  ;;  %v1418_v15 = vpop.f32.mrb[79].mxu0  ;;  %v1669_v18 = vpop.f32.mrb[79].mxu1  ;;  %v1732_v60 = vunpack.c.0.s8 (!%p2032_p7), %v1731_v56 }
 0x321   : > { %v1455_v16 = vmax.f32 %v1453_v4, %v1418_v15  ;;  %v1706_v7 = vmax.f32 %v1704_v5, %v1669_v18 }
 0x322   : > { %v1435_v19 = vmax.f32 %v1433_v61, %v1434_v13  ;;  %v1686_v20 = vmax.f32 %v1684_v62, %v1685_v14  ;;  %v1735_v63 = vsub.s32 (!%p2032_p7), %v1732_v60, %v1734_v57 }
 0x323   : > { %v1456_v21 = vmax.f32 %v1454_v9, %v1455_v16  ;;  %v1707_v22 = vmax.f32 %v1705_v10, %v1706_v7 }
 0x324   : > { %v1436_v23 = vrot.slane %v1435_v19, 4  ;;  %v1687_v24 = vrot.slane %v1686_v20, 4  ;;  %v1736_v0 = vrot.slane (!%p2032_p7), %v1726_v42, %v1735_v63  ;;  %v1743_v1 = vrot.slane (!%p2032_p7), %v1727_v58, %v1735_v63 }
 0x325   : > { %v1457_v25 = vrot.slane %v1456_v21, 4  ;;  %v1708_v26 = vrot.slane %v1707_v22, 4 }
 0x326   : > { %v1437_v27 = vmax.f32 %v1435_v19, %v1436_v23  ;;  %v1688_v28 = vmax.f32 %v1686_v20, %v1687_v24  ;;  %v1758_v4 = vcombine.low (!%p2032_p7), %v1736_v0, %v1743_v1 }
 0x327   : > { %v1458_v31 = vmax.f32 %v1456_v21, %v1457_v25  ;;  %v1709_v32 = vmax.f32 %v1707_v22, %v1708_v26 }
 0x328   : > { %v1438_v35 = vrot.slane %v1437_v27, 2  ;;  %v1689_v36 = vrot.slane %v1688_v28, 2  ;;  %v1766_v33 = vrot.slane (!%p2032_p7), %v1758_v4, %v1735_v63 }
 0x329   : > { %v1459_v39 = vrot.slane %v1458_v31, 2  ;;  %v1710_v40 = vrot.slane %v1709_v32, 2  ;;  %1717 = sbr.rel (%p2032_p7) target bundleno = 828 (0x33c), region = 48 }
 0x32a   : > { %v1439_v41 = vmax.f32 %v1437_v27, %v1438_v35  ;;  %v1690_v43 = vmax.f32 %v1688_v28, %v1689_v36 }
 0x32b   : > { %v1460_v44 = vmax.f32 %v1458_v31, %v1459_v39  ;;  %v1711_v45 = vmax.f32 %v1709_v32, %v1710_v40 }
 0x32c   : > { %v1440_v46 = vrot.slane %v1439_v41, 1  ;;  %v1691_v47 = vrot.slane %v1690_v43, 1 }
 0x32d   : > { %v1461_v48 = vrot.slane %v1460_v44, 1  ;;  %v1712_v49 = vrot.slane %v1711_v45, 1 }
 0x32e   : > { %v1441_v50 = vmax.f32 %v1439_v41, %v1440_v46  ;;  %v1692_v51 = vmax.f32 %v1690_v43, %v1691_v47 }
 0x32f   : > { %v1462_v52 = vmax.f32 %v1460_v44, %v1461_v48  ;;  %v1713_v53 = vmax.f32 %v1711_v45, %v1712_v49 }
 0x331   : > { %v1728_v17 = vcombine.low %v1441_v50, %v1462_v52  ;;  %v1729_v59 = vcombine.low %v1692_v51, %v1713_v53 }
 0x333   : > { %v1750_v2 = vrot.slane %v1728_v17, %v1735_v63  ;;  %v1757_v3 = vrot.slane %v1729_v59, %v1735_v63 }
 0x335   : > { %v1759_v5 = vcombine.low %v1750_v2, %v1757_v3 }
 0x337   : > { %v1773_v34 = vrot.slane %v1759_v5, %v1735_v63 }
 0x339   : > { %v1774_v61 = vcombine.low %v1766_v33, %v1773_v34 }
 0x33b   : > { %1776 = vst [vmem:[%s2278_s16] sm:$0xff] %v1774_v61 }
 0x33c PF: > { %p2033_p8 = scmp.le.s32.totalorder %s2177_s21, 0 }
 0x33d   : > { %v1797_v62 = vlaneseq (!%p2033_p8)  ;;  %v2197_v6 = vmov (!%p2033_p8), 1966171168   ;;  %v1790_v9 = vcombine.low (!%p2033_p8), %v2624_v29, %v2628_v37  ;;  %v1791_v11 = vcombine.low (!%p2033_p8), %v2626_v30, %v2630_v38 }
 0x33e   : > { %1780 = sbr.rel (%p2033_p8) target bundleno = 847 (0x34f), region = 52  ;;  %v1795_v8 = vunpack.c.l.s4 (!%p2033_p8), %v2197_v6  ;;  %v1792_v12 = vcombine.low (!%p2033_p8), %v1441_v50, %v1462_v52  ;;  %v1793_v13 = vcombine.low (!%p2033_p8), %v1692_v51, %v1713_v53 }
 0x33f   : > { %v1798_v10 = vshrl.u32 (!%p2033_p8), %v1797_v62, 7 }
 0x340   : > { %v1796_v14 = vunpack.c.0.s8 (!%p2033_p8), %v1795_v8 }
 0x342   : > { %v1799_v15 = vsub.s32 (!%p2033_p8), %v1796_v14, %v1798_v10  ;;  %v1781_v24 = vld [vmem:[%s2278_s16] sm:$0xff] (!%p2033_p8) }
 0x344   : > { %v1800_v18 = vrot.slane (!%p2033_p8), %v1790_v9, %v1799_v15  ;;  %v1807_v16 = vrot.slane (!%p2033_p8), %v1791_v11, %v1799_v15  ;;  %v1814_v7 = vrot.slane (!%p2033_p8), %v1792_v12, %v1799_v15  ;;  %v1821_v19 = vrot.slane (!%p2033_p8), %v1793_v13, %v1799_v15 }
 0x346   : > { %v1822_v20 = vcombine.low %v1800_v18, %v1807_v16  ;;  %v1823_v21 = vcombine.low %v1814_v7, %v1821_v19 }
 0x348   : > { %v1830_v22 = vrot.slane %v1822_v20, %v1799_v15  ;;  %v1837_v23 = vrot.slane %v1823_v21, %v1799_v15 }
 0x34a   : > { %v1838_v25 = vcombine.low %v1830_v22, %v1837_v23 }
 0x34c   : > { %v1840_v29 = vmax.f32 %v1781_v24, %v1838_v25 }
 0x34e   : > { %1841 = vst [vmem:[%s2278_s16] sm:$0xff] %v1840_v29 }
 0x34f PF: > { %s16_s25 = sadd.s32 1, %s2193_s25   ;;  %s2667_s21 = smov %s2185_s23 }
 0x350   : > { %p13_p9 = scmp.ge.s32.totalorder %s16_s25, 6   ;;  %s2668_s22 = smov %s2189_s24 }
 0x351   : > { %s2669_s23 = smov %s2672_s26  ;;  %s2670_s24 = smov %s2676_s27 }
 0x352   :  { %15 = sbr.rel (!%p13_p9) target bundleno = 3 (0x3), region = 82 }

// kernel: pointnetfeat_forward.3
= control target key start
LH: loop header
LB: loop body
LE: loop exit
PB: predicated region body
PF: predicated region fallthrough
CT: control target
= control target key end

     0   :  { %s2263_s21 = smov 0   ;;  %s2265_s22 = smov 0   ;;  %s2690_s0 = inlined_call_operand.vmem [shape: bf16[2,256,8], index: 0, kind: input, shape index: {}]   ;;  %s2691_s1 = inlined_call_operand.vmem [shape: bf16[2,8,64], index: 1, kind: input, shape index: {}]   ;;  %s2692_s2 = inlined_call_operand.vmem [shape: bf16[64,128], index: 2, kind: input, shape index: {}]   ;;  %s2693_s3 = inlined_call_operand.vmem [shape: bf16[128,1024], index: 3, kind: input, shape index: {}]   ;;  %s2694_s4 = inlined_call_operand.vmem [shape: f32[1,64], index: 4, kind: input, shape index: {}]   ;;  %s2695_s5 = inlined_call_operand.vmem [shape: f32[1,128], index: 5, kind: input, shape index: {}]   ;;  %s2696_s6 = inlined_call_operand.vmem [shape: f32[2,1,1024], index: 6, kind: output, shape index: {}]  }
   0x1   :  { %s2267_s23 = smov 0   ;;  %s2269_s24 = smov 0  }
   0x2   :  { %s2271_s25 = smov 0  }
   0x3 LB: > { %s28_s26 = sadd.s32 1, %s2215_s23  ;;  %s35_s27 = sadd.s32 1, %s2219_s24  ;;  %s2223_s25 = sphi %s2271_s25, %s16_s25   ;;  %s2219_s24 = sphi %s2269_s24, %s2700_s24   ;;  %s2215_s23 = sphi %s2267_s23, %s2699_s23   ;;  %s2211_s22 = sphi %s2265_s22, %s2698_s22   ;;  %s2207_s21 = sphi %s2263_s21, %s2697_s21  }
   0x4   : > { %p29_p0 = scmp.ge.s32.totalorder %s28_s26, 2  ;;  %p1962_p1 = scmp.ge.s32.totalorder %s2223_s25, 1 }
   0x5   : > { %p257_p2 = scmp.lt.s32.totalorder %s2223_s25, 5 }
   0x6   : > { %s2702_s26 = smov (%p29_p0, %s28_s26), 0  ;;  %s2704_s27 = smov (!%p29_p0, %s35_s27), %s2219_s24 }
   0x7   : > { %p258_p3 = pnand %p1962_p1, %p257_p2  ;;  %p37_p4 = scmp.ge.s32.totalorder %s2704_s27, 2 }
   0x8   : > { %s1963_s28 = sshll.u32 (!%p258_p3), %s2207_s21, 4  ;;  %p303_p5 = scmp.lt.s32.totalorder (!%p258_p3), %s2211_s22, 1  ;;  %v2181_v0 = vld [vmem:[%s2692_s2] sm:$0xff] (!%p258_p3)   ;;  %v2182_v1 = vld [vmem:[%s2692_s2 + $0x8] sm:$0xff] (!%p258_p3)   ;;  %vm417_vm0 = vcmask (!%p258_p3), 1043456   ;;  %vm392_vm1 = vcmask (!%p258_p3), 64512  }
   0x9   : > { %s2706_s27 = smov (%p37_p4, %s2704_s27), 0  ;;  %261 = sbr.rel (%p258_p3) target bundleno = 848 (0x350), region = 44 }
   0xa   : > { %p305_p6 = scmp.lt.s32.totalorder (!%p258_p3), %s1963_s28, 31  ;;  %2105 = vmatprep.subr.bf16.mxu1 (!%p258_p3), %v2181_v0  ;;  %v2183_v12 = vld [vmem:[%s2692_s2 + $0x10] sm:$0xff] (!%p258_p3)   ;;  %v2184_v13 = vld [vmem:[%s2692_s2 + $0x18] sm:$0xff] (!%p258_p3)   ;;  %v727_v14 = vld [vmem:[%s2693_s3] sm:$0xff] (!%p258_p3)  ;;  %vm581_vm2 = vcmask (!%p258_p3), 523264   ;;  %p2062_p7 = scmp.ne.s32.totalorder (!%p258_p3), %s2207_s21, 0 }
   0xb   : > { %2106 = vmatpush3.bf16.msra.mxu1 (!%p258_p3), %v2181_v0  ;;  %v728_v15 = vld [vmem:[%s2693_s3 + $0x20] sm:$0xff] (!%p258_p3)  ;;  %v2336_v16 = vld [vmem:[%s2693_s3 + $0x8] sm:$0xff] (!%p258_p3) }
   0xc   : > { %2107 = vmatprep.subr.bf16.mxu1 (!%p258_p3), %v2182_v1  ;;  %v1998_v17 = vcombine.low (!%p258_p3), %v727_v14, %v728_v15  ;;  %v1999_v18 = vcombine.high (!%p258_p3), %v727_v14, %v728_v15  ;;  %v2341_v19 = vld [vmem:[%s2693_s3 + $0x28] sm:$0xff] (!%p258_p3)  ;;  %v729_v20 = vld [vmem:[%s2693_s3 + $0x40] sm:$0xff] (!%p258_p3) }
   0xd   : > { %v730_v21 = vld [vmem:[%s2693_s3 + $0x60] sm:$0xff] (!%p258_p3)  ;;  %v2014_v22 = vcombine.low (!%p258_p3), %v2336_v16, %v2341_v19  ;;  %v2015_v23 = vcombine.high (!%p258_p3), %v2336_v16, %v2341_v19  ;;  %v980_v55 = vld [vmem:[%s2693_s3 + $0x48] sm:$0xff] (!%p258_p3) }
   0xe   : > { %v2001_v24 = vcombine.high (!%p258_p3), %v729_v20, %v730_v21  ;;  %v731_v25 = vld [vmem:[%s2693_s3 + $0x80] sm:$0xff] (!%p258_p3)  ;;  %v2000_v27 = vcombine.low (!%p258_p3), %v729_v20, %v730_v21  ;;  %v981_v56 = vld [vmem:[%s2693_s3 + $0x68] sm:$0xff] (!%p258_p3) }
   0xf   : > { %2108 = vmatpush3.bf16.msra.mxu1 (!%p258_p3), %v2182_v1  ;;  %v732_v26 = vld [vmem:[%s2693_s3 + $0xa0] sm:$0xff] (!%p258_p3)  ;;  %v2017_v62 = vcombine.high (!%p258_p3), %v980_v55, %v981_v56  ;;  %v982_v1 = vld [vmem:[%s2693_s3 + $0x88] sm:$0xff] (!%p258_p3) }
  0x10   : > { %s2708_s22 = smov (!%p303_p5, %s2211_s22), 1  ;;  %s2710_s28 = smov (!%p305_p6, %s1963_s28), 31  ;;  %2109 = vmatprep.subr.bf16.mxu1 %v2183_v12  ;;  %v2003_v28 = vcombine.high %v731_v25, %v732_v26  ;;  %v733_v29 = vld [vmem:[%s2693_s3 + $0xc0] sm:$0xff]  ;;  %v2002_v31 = vcombine.low %v731_v25, %v732_v26 }
  0x11   : > { %s1964_s9 = sshll.u32 %s2708_s22, 5  ;;  %s1966_s10 = sshll.u32 %s2708_s22, 2  ;;  %v734_v30 = vld [vmem:[%s2693_s3 + $0xe0] sm:$0xff] }
  0x12   : > { %s308_s11 = sadd.s32 %s1964_s9, %s2710_s28  ;;  %s317_s14 = scalar_lea.vmem %s2691_s1, %s1966_s10  ;;  %v2005_v32 = vcombine.high %v733_v29, %v734_v30  ;;  %v735_v33 = vld [vmem:[%s2693_s3 + $0x100] sm:$0xff]  ;;  %v2004_v35 = vcombine.low %v733_v29, %v734_v30 }
  0x13   : > { %s1965_s15 = sshll.u32 %s308_s11, 2  ;;  %s1967_s16 = sshll.u32 %s2708_s22, 3  ;;  %v344_v2 = vld [vmem:[%s317_s14] sm:$0xf]  ;;  %2110 = vmatpush3.bf16.msra.mxu1 %v2183_v12  ;;  %v984_v12 = vld [vmem:[%s2693_s3 + $0xc8] sm:$0xff] }
  0x14   : > { %s310_s19 = scalar_lea.vmem %s2690_s0, %s1965_s15  ;;  %s2311_s30 = scalar_lea.vmem %s2696_s6, %s1967_s16  ;;  %2129 = vmatprep.subr.msk.bf16.mxu0 %vm417_vm0, %v344_v2  ;;  %v419_v3 = vsel %vm417_vm0, %v344_v2, 0  ;;  %2111 = vmatprep.subr.bf16.mxu1 %v2184_v13  ;;  %v736_v34 = vld [vmem:[%s2693_s3 + $0x120] sm:$0xff]  ;;  %v983_v2 = vld [vmem:[%s2693_s3 + $0xa8] sm:$0xff] }
  0x15   : > { %2088 = vmatpush3.bf16.msra.mxu0 %v419_v3  ;;  %v2173_v4 = vld [vmem:[%s310_s19] sm:$0xff]   ;;  %v2174_v5 = vld [vmem:[%s310_s19 + $0x8] sm:$0xff]   ;;  %v2175_v6 = vld [vmem:[%s310_s19 + $0x10] sm:$0xff]   ;;  %v2007_v36 = vcombine.high %v735_v33, %v736_v34  ;;  %v2006_v39 = vcombine.low %v735_v33, %v736_v34 }
  0x16   : > { %2089 = vmatprep.mubr.msk.bf16.mxu0 %vm392_vm1, %v2173_v4  ;;  %v2176_v7 = vld [vmem:[%s310_s19 + $0x18] sm:$0xff]   ;;  %v2177_v8 = vld [vmem:[%s310_s19 + $0x20] sm:$0xff]   ;;  %v2178_v9 = vld [vmem:[%s310_s19 + $0x28] sm:$0xff]   ;;  %823 = vmatprep.subr.bf16.mxu0 %v1999_v18  ;;  %v2018_v18 = vcombine.low %v982_v1, %v983_v2 }
  0x17   : > { %v2179_v10 = vld [vmem:[%s310_s19 + $0x30] sm:$0xff]   ;;  %v2180_v11 = vld [vmem:[%s310_s19 + $0x38] sm:$0xff]   ;;  %2112 = vmatpush3.bf16.msra.mxu1 %v2184_v13  ;;  %v737_v37 = vld [vmem:[%s2693_s3 + $0x140] sm:$0xff] }
  0x18   : > { %2090 = vmatmul.mubr.msk.bf16.vlgmr.msra.gmra.mrb[0].mxu0 %vm392_vm1, %v2174_v5  ;;  %1074 = vmatprep.subr.bf16.mxu1 %v2015_v23  ;;  %v738_v38 = vld [vmem:[%s2693_s3 + $0x160] sm:$0xff]  ;;  %v985_v13 = vld [vmem:[%s2693_s3 + $0xe8] sm:$0xff] }
  0x19   : > { %2093 = vmatprep.mubr.msk.bf16.mxu0 %vm392_vm1, %v2175_v6  ;;  %824 = vmatpush1.bf16.msra.mxu0 %v1998_v17  ;;  %v2009_v40 = vcombine.high %v737_v37, %v738_v38  ;;  %v2008_v41 = vcombine.low %v737_v37, %v738_v38  ;;  %v2380_v42 = vld [vmem:[%s2694_s4] ss:$0 sm:$0xff]  ;;  %v2021_v20 = vcombine.high %v984_v12, %v985_v13  ;;  %v986_v23 = vld [vmem:[%s2693_s3 + $0x108] sm:$0xff] }
  0x1a   : > { %825 = vmatprep.subr.bf16.mxu0 %v2001_v24  ;;  %v987_v24 = vld [vmem:[%s2693_s3 + $0x128] sm:$0xff]  ;;  %v2020_v30 = vcombine.low %v984_v12, %v985_v13  ;;  %v1481_v13 = vld [vmem:[%s2693_s3 + $0x38] sm:$0xff] }
  0x1b   : > { %v988_v34 = vld [vmem:[%s2693_s3 + $0x148] sm:$0xff] }
  0x1d   : > { %826 = vmatpush1.bf16.msra.mxu0 %v2000_v27 }
  0x1e   : > { %827 = vmatprep.subr.bf16.mxu0 %v2003_v28 }
  0x20   : > { %2094 = vmatmul.mubr.msk.bf16.gmra.mrb[4].mxu0 %vm392_vm1, %v2176_v7 }
  0x21   : > { %2097 = vmatprep.mubr.msk.bf16.mxu0 %vm392_vm1, %v2177_v8  ;;  %828 = vmatpush1.bf16.msra.mxu0 %v2002_v31  ;;  %v2016_v8 = vcombine.low %v980_v55, %v981_v56  ;;  %v739_v56 = vld [vmem:[%s2693_s3 + $0x180] sm:$0xff] }
  0x22   : > { %829 = vmatprep.subr.bf16.mxu0 %v2005_v32  ;;  %v2023_v32 = vcombine.high %v986_v23, %v987_v24 }
  0x25   : > { %830 = vmatpush1.bf16.msra.mxu0 %v2004_v35  ;;  %v989_v35 = vld [vmem:[%s2693_s3 + $0x168] sm:$0xff] }
  0x26   : > { %831 = vmatprep.subr.bf16.mxu0 %v2007_v36 }
  0x28   : > { %2098 = vmatmul.mubr.msk.bf16.gmra.mrb[8].mxu0 %vm392_vm1, %v2178_v9 }
  0x29   : > { %2101 = vmatprep.mubr.msk.bf16.mxu0 %vm392_vm1, %v2179_v10  ;;  %832 = vmatpush1.bf16.msra.mxu0 %v2006_v39  ;;  %v2019_v10 = vcombine.high %v982_v1, %v983_v2  ;;  %v2022_v39 = vcombine.low %v986_v23, %v987_v24  ;;  %v992_v1 = vld [vmem:[%s2693_s3 + $0x1c8] sm:$0xff] }
  0x2a   : > { %833 = vmatprep.subr.bf16.mxu0 %v2009_v40 }
  0x2d   : > { %834 = vmatpush1.bf16.msra.mxu0 %v2008_v41 }
  0x30   : > { %2102 = vmatmul.mubr.msk.bf16.gmra.mrb[12].mxu0 %vm392_vm1, %v2180_v11 }
  0xeb   : > { %v2091_v43 = vpop.f32.mrb[0].mxu0 }
  0xec   : > { %v464_v44 = vadd.f32 %v2091_v43, %v2380_v42  ;;  %v455_v45 = vpop.f32.mrb[1].mxu0  ;;  %v2025_v43 = vcombine.high %v988_v34, %v989_v35 }
  0xed   : > { %v456_v46 = vadd.f32 %v2380_v42, %v455_v45  ;;  %v2092_v47 = vpop.f32.mrb[2].mxu0 }
  0xee   : > { %v467_v48 = vadd.f32 %v2092_v47, %v2380_v42  ;;  %v458_v49 = vpop.f32.mrb[3].mxu0  ;;  %v520_v51 = vmax.f32 %v464_v44, 0.0 }
  0xef   : > { %v459_v50 = vadd.f32 %v2380_v42, %v458_v49  ;;  %v518_v53 = vmax.f32 %v456_v46, 0.0 }
  0xf0   : > { %v521_v52 = vmax.f32 %v467_v48, 0.0 }
  0xf1   : > { %v519_v54 = vmax.f32 %v459_v50, 0.0 }
  0xf2   : > { %v535_v57 = vpack.c.bf16 %v521_v52, %v520_v51  ;;  %v2024_v51 = vcombine.low %v988_v34, %v989_v35 }
  0xf3   : > { %v2095_v58 = vpop.f32.mrb[4].mxu0  ;;  %v534_v59 = vpack.c.bf16 %v519_v54, %v518_v53 }
  0xf4   : > { %v480_v60 = vadd.f32 %v2095_v58, %v2380_v42  ;;  %v471_v61 = vpop.f32.mrb[5].mxu0 }
  0xf5   : > { %v472_v63 = vadd.f32 %v2380_v42, %v471_v61  ;;  %2113 = vmatprep.mubr.msk.bf16.mxu1 %vm581_vm2, %v534_v59  ;;  %v2096_v0 = vpop.f32.mrb[6].mxu0  ;;  %v991_v59 = vld [vmem:[%s2693_s3 + $0x1a8] sm:$0xff] }
  0xf6   : > { %v524_v3 = vmax.f32 %v480_v60, 0.0  ;;  %v483_v4 = vadd.f32 %v2096_v0, %v2380_v42  ;;  %2114 = vmatmul.mubr.msk.bf16.vlgmr.msra.gmra.mrb[0].mxu1 %vm581_vm2, %v535_v57  ;;  %v474_v5 = vpop.f32.mrb[7].mxu0  ;;  %v990_v57 = vld [vmem:[%s2693_s3 + $0x188] sm:$0xff]  ;;  %v742_v0 = vld [vmem:[%s2693_s3 + $0x1e0] sm:$0xff] }
  0xf7   : > { %v522_v6 = vmax.f32 %v472_v63, 0.0  ;;  %v475_v7 = vadd.f32 %v2380_v42, %v474_v5  ;;  %1075 = vmatpush1.bf16.msra.mxu1 %v2014_v22  ;;  %v2026_v61 = vcombine.low %v990_v57, %v991_v59  ;;  %v741_v63 = vld [vmem:[%s2693_s3 + $0x1c0] sm:$0xff] }
  0xf8   : > { %v525_v9 = vmax.f32 %v483_v4, 0.0  ;;  %1076 = vmatprep.subr.bf16.mxu1 %v2017_v62  ;;  %v2027_v62 = vcombine.high %v990_v57, %v991_v59  ;;  %v2013_v2 = vcombine.high %v741_v63, %v742_v0  ;;  %v2012_v4 = vcombine.low %v741_v63, %v742_v0  ;;  %v1486_v59 = vld [vmem:[%s2693_s3 + $0xd8] sm:$0xff] }
  0xf9   : > { %v523_v11 = vmax.f32 %v475_v7, 0.0  ;;  %v2225_v7 = vmov 0  }
  0xfa   : > { %v537_v14 = vpack.c.bf16 %v525_v9, %v524_v3  ;;  %v993_v3 = vld [vmem:[%s2693_s3 + $0x1e8] sm:$0xff]  ;;  %855 = vmatprep.mubr.bf16.mxu0 %v2225_v7  ;;  %v1230_v9 = vld [vmem:[%s2693_s3 + $0x30] sm:$0xff] }
  0xfb   : > { %v536_v15 = vpack.c.bf16 %v523_v11, %v522_v6  ;;  %v2099_v17 = vpop.f32.mrb[8].mxu0  ;;  %1077 = vmatpush1.bf16.msra.mxu1 %v2016_v8  ;;  %v2028_v5 = vcombine.low %v992_v1, %v993_v3  ;;  %v2029_v6 = vcombine.high %v992_v1, %v993_v3  ;;  %v1229_v8 = vld [vmem:[%s2693_s3 + $0x10] sm:$0xff] }
  0xfc   : > { %v496_v16 = vadd.f32 %v2099_v17, %v2380_v42  ;;  %v487_v19 = vpop.f32.mrb[9].mxu0  ;;  %1078 = vmatprep.subr.bf16.mxu1 %v2019_v10  ;;  %v1480_v10 = vld [vmem:[%s2693_s3 + $0x18] sm:$0xff]  ;;  %v2030_v11 = vcombine.low %v1229_v8, %v1230_v9  ;;  %v2031_v12 = vcombine.high %v1229_v8, %v1230_v9  ;;  %v2480_v17 = vld [vmem:[%s2695_s5] ss:$0 sm:$0xff] }
  0xfd   : > { %2117 = vmatprep.mubr.msk.bf16.mxu1 %vm581_vm2, %v536_v15  ;;  %v488_v21 = vadd.f32 %v2380_v42, %v487_v19  ;;  %v2100_v22 = vpop.f32.mrb[10].mxu0  ;;  %v2047_v15 = vcombine.high %v1480_v10, %v1481_v13 }
  0xfe   : > { %2118 = vmatmul.mubr.msk.bf16.gmra.mrb[4].mxu1 %vm581_vm2, %v537_v14  ;;  %v528_v25 = vmax.f32 %v496_v16, 0.0  ;;  %v499_v26 = vadd.f32 %v2100_v22, %v2380_v42  ;;  %v490_v27 = vpop.f32.mrb[11].mxu0  ;;  %v2046_v14 = vcombine.low %v1480_v10, %v1481_v13  ;;  %v1238_v10 = vld [vmem:[%s2693_s3 + $0x130] sm:$0xff] }
  0xff   : > { %v526_v28 = vmax.f32 %v488_v21, 0.0  ;;  %v491_v29 = vadd.f32 %v2380_v42, %v490_v27  ;;  %1079 = vmatpush1.bf16.msra.mxu1 %v2018_v18  ;;  %v1231_v27 = vld [vmem:[%s2693_s3 + $0x50] sm:$0xff] }
 0x100   : > { %v529_v31 = vmax.f32 %v499_v26, 0.0  ;;  %1080 = vmatprep.subr.bf16.mxu1 %v2021_v20 }
 0x101   : > { %v527_v33 = vmax.f32 %v491_v29, 0.0 }
 0x102   : > { %v539_v36 = vpack.c.bf16 %v529_v31, %v528_v25  ;;  %v1482_v31 = vld [vmem:[%s2693_s3 + $0x58] sm:$0xff] }
 0x103   : > { %v538_v37 = vpack.c.bf16 %v527_v33, %v526_v28  ;;  %v2103_v38 = vpop.f32.mrb[12].mxu0  ;;  %1081 = vmatpush1.bf16.msra.mxu1 %v2020_v30  ;;  %v1232_v30 = vld [vmem:[%s2693_s3 + $0x70] sm:$0xff] }
 0x104   : > { %v512_v40 = vadd.f32 %v2103_v38, %v2380_v42  ;;  %v503_v41 = vpop.f32.mrb[13].mxu0  ;;  %1082 = vmatprep.subr.bf16.mxu1 %v2023_v32  ;;  %v1483_v32 = vld [vmem:[%s2693_s3 + $0x78] sm:$0xff] }
 0x105   : > { %2121 = vmatprep.mubr.msk.bf16.mxu1 %vm581_vm2, %v538_v37  ;;  %v504_v44 = vadd.f32 %v2380_v42, %v503_v41  ;;  %v2104_v45 = vpop.f32.mrb[14].mxu0  ;;  %v1234_v41 = vld [vmem:[%s2693_s3 + $0xb0] sm:$0xff] }
 0x106   : > { %2122 = vmatmul.mubr.msk.bf16.gmra.mrb[8].mxu1 %vm581_vm2, %v539_v36  ;;  %v532_v46 = vmax.f32 %v512_v40, 0.0  ;;  %v515_v47 = vadd.f32 %v2104_v45, %v2380_v42  ;;  %v506_v48 = vpop.f32.mrb[15].mxu0  ;;  %v1233_v36 = vld [vmem:[%s2693_s3 + $0x90] sm:$0xff]  ;;  %v2049_v40 = vcombine.high %v1482_v31, %v1483_v32 }
 0x107   : > { %v530_v49 = vmax.f32 %v504_v44, 0.0  ;;  %v507_v50 = vadd.f32 %v2380_v42, %v506_v48  ;;  %1083 = vmatpush1.bf16.msra.mxu1 %v2022_v39  ;;  %v740_v42 = vld [vmem:[%s2693_s3 + $0x1a0] sm:$0xff]  ;;  %v2033_v39 = vcombine.high %v1231_v27, %v1232_v30  ;;  %v1485_v44 = vld [vmem:[%s2693_s3 + $0xb8] sm:$0xff]  ;;  %v2034_v0 = vcombine.low %v1233_v36, %v1234_v41 }
 0x108   : > { %v533_v52 = vmax.f32 %v515_v47, 0.0  ;;  %1084 = vmatprep.subr.bf16.mxu1 %v2025_v43  ;;  %v2011_v58 = vcombine.high %v739_v56, %v740_v42  ;;  %v2010_v60 = vcombine.low %v739_v56, %v740_v42  ;;  %v1484_v43 = vld [vmem:[%s2693_s3 + $0x98] sm:$0xff]  ;;  %v1235_v42 = vld [vmem:[%s2693_s3 + $0xd0] sm:$0xff] }
 0x109   : > { %v531_v53 = vmax.f32 %v507_v50, 0.0  ;;  %v2032_v50 = vcombine.low %v1231_v27, %v1232_v30  ;;  %v2050_v1 = vcombine.low %v1484_v43, %v1485_v44  ;;  %v1490_v27 = vld [vmem:[%s2693_s3 + $0x158] sm:$0xff] }
 0x10a   : > { %v541_v54 = vpack.c.bf16 %v533_v52, %v532_v46  ;;  %835 = vmatprep.subr.bf16.mxu0 %v2011_v58  ;;  %v1236_v58 = vld [vmem:[%s2693_s3 + $0xf0] sm:$0xff] }
 0x10b   : > { %v540_v55 = vpack.c.bf16 %v531_v53, %v530_v49  ;;  %1085 = vmatpush1.bf16.msra.mxu1 %v2024_v51  ;;  %836 = vmatpush1.bf16.msra.mxu0 %v2010_v60  ;;  %v2048_v51 = vcombine.low %v1482_v31, %v1483_v32  ;;  %v1487_v60 = vld [vmem:[%s2693_s3 + $0xf8] sm:$0xff] }
 0x10c   : > { %1086 = vmatprep.subr.bf16.mxu1 %v2027_v62  ;;  %837 = vmatprep.subr.bf16.mxu0 %v2013_v2 }
 0x10d   : > { %2125 = vmatprep.mubr.msk.bf16.mxu1 %vm581_vm2, %v540_v55  ;;  %v2051_v55 = vcombine.high %v1484_v43, %v1485_v44  ;;  %v1242_v44 = vld [vmem:[%s2693_s3 + $0x1b0] sm:$0xff] }
 0x10e   : > { %2126 = vmatmul.mubr.msk.bf16.gmra.mrb[12].mxu1 %vm581_vm2, %v541_v54  ;;  %v2035_v54 = vcombine.high %v1233_v36, %v1234_v41 }
 0x10f   : > { %1087 = vmatpush1.bf16.msra.mxu1 %v2026_v61  ;;  %838 = vmatpush1.bf16.msra.mxu0 %v2012_v4  ;;  %v2037_v4 = vcombine.high %v1235_v42, %v1236_v58 }
 0x110   : > { %1088 = vmatprep.subr.bf16.mxu1 %v2029_v6  ;;  %1106 = vmatprep.mubr.bf16.mxu1 %v2225_v7  ;;  %v1237_v6 = vld [vmem:[%s2693_s3 + $0x110] sm:$0xff] }
 0x111   : > { %1325 = vmatprep.subr.bf16.mxu0 %v2031_v12  ;;  %v1489_v12 = vld [vmem:[%s2693_s3 + $0x138] sm:$0xff]  ;;  %v2038_v32 = vcombine.low %v1237_v6, %v1238_v10 }
 0x113   : > { %1089 = vmatpush1.bf16.msra.mxu1 %v2028_v5  ;;  %v2053_v5 = vcombine.high %v1486_v59, %v1487_v60 }
 0x114   : > { %1576 = vmatprep.subr.bf16.mxu1 %v2047_v15 }
 0x1c9   : > { %v2115_v18 = vpop.f32.mrb[0].mxu1 }
 0x1ca   : > { %v649_v16 = vadd.f32 %v2115_v18, %v2480_v17  ;;  %v640_v19 = vpop.f32.mrb[1].mxu1 }
 0x1cb   : > { %v641_v20 = vadd.f32 %v2480_v17, %v640_v19  ;;  %v2116_v21 = vpop.f32.mrb[2].mxu1  ;;  %v2036_v19 = vcombine.low %v1235_v42, %v1236_v58  ;;  %v1243_v42 = vld [vmem:[%s2693_s3 + $0x1d0] sm:$0xff] }
 0x1cc   : > { %v652_v22 = vadd.f32 %v2116_v21, %v2480_v17  ;;  %v643_v23 = vpop.f32.mrb[3].mxu1  ;;  %v705_v25 = vmax.f32 %v649_v16, 0.0  ;;  %v1244_v58 = vld [vmem:[%s2693_s3 + $0x1f0] sm:$0xff] }
 0x1cd   : > { %v644_v24 = vadd.f32 %v2480_v17, %v643_v23  ;;  %v703_v28 = vmax.f32 %v641_v20, 0.0  ;;  %v2052_v20 = vcombine.low %v1486_v59, %v1487_v60  ;;  %v1495_v59 = vld [vmem:[%s2693_s3 + $0x1f8] sm:$0xff] }
 0x1ce   : > { %v706_v26 = vmax.f32 %v652_v22, 0.0  ;;  %v2039_v22 = vcombine.high %v1237_v6, %v1238_v10 }
 0x1cf   : > { %v704_v29 = vmax.f32 %v644_v24, 0.0  ;;  %v1239_v24 = vld [vmem:[%s2693_s3 + $0x150] sm:$0xff] }
 0x1d0   : > { %v2498_v33 = vpack.c.bf16 %v706_v26, %v705_v25  ;;  %v1240_v26 = vld [vmem:[%s2693_s3 + $0x170] sm:$0xff] }
 0x1d1   : > { %v2500_v34 = vpack.c.bf16 %v704_v29, %v703_v28  ;;  %v2119_v35 = vpop.f32.mrb[4].mxu1  ;;  %v1491_v28 = vld [vmem:[%s2693_s3 + $0x178] sm:$0xff] }
 0x1d2   : > { %v665_v37 = vadd.f32 %v2119_v35, %v2480_v17  ;;  %v656_v38 = vpop.f32.mrb[5].mxu1 }
 0x1d3   : > { %v657_v45 = vadd.f32 %v2480_v17, %v656_v38  ;;  %856 = vmatmul.mubr.bf16.vlgmr.msra.gmra.mrb[16].mxu0 %v2500_v34  ;;  %1107 = vmatmul.mubr.bf16.vlgmr.msra.gmra.mrb[16].mxu1 %v2500_v34  ;;  %v2120_v46 = vpop.f32.mrb[6].mxu1  ;;  %v2041_v38 = vcombine.high %v1239_v24, %v1240_v26 }
 0x1d4   : > { %v709_v47 = vmax.f32 %v665_v37, 0.0  ;;  %1326 = vmatpush1.bf16.msra.mxu0 %v2030_v11  ;;  %1577 = vmatpush1.bf16.msra.mxu1 %v2046_v14  ;;  %v668_v48 = vadd.f32 %v2120_v46, %v2480_v17  ;;  %v659_v49 = vpop.f32.mrb[7].mxu1  ;;  %v1488_v11 = vld [vmem:[%s2693_s3 + $0x118] sm:$0xff] }
 0x1d5   : > { %v707_v52 = vmax.f32 %v657_v45, 0.0  ;;  %v660_v53 = vadd.f32 %v2480_v17, %v659_v49  ;;  %865 = vmatprep.mubr.bf16.mxu0 %v2225_v7  ;;  %1116 = vmatprep.mubr.bf16.mxu1 %v2225_v7  ;;  %v2055_v23 = vcombine.high %v1488_v11, %v1489_v12  ;;  %v2054_v35 = vcombine.low %v1488_v11, %v1489_v12  ;;  %v1492_v45 = vld [vmem:[%s2693_s3 + $0x198] sm:$0xff] }
 0x1d6   : > { %v710_v56 = vmax.f32 %v668_v48, 0.0  ;;  %1327 = vmatprep.subr.bf16.mxu0 %v2033_v39  ;;  %1578 = vmatprep.subr.bf16.mxu1 %v2049_v40  ;;  %v2057_v39 = vcombine.high %v1490_v27, %v1491_v28  ;;  %v1241_v40 = vld [vmem:[%s2693_s3 + $0x190] sm:$0xff]  ;;  %v1493_v46 = vld [vmem:[%s2693_s3 + $0x1b8] sm:$0xff] }
 0x1d7   : > { %v708_v57 = vmax.f32 %v660_v53, 0.0  ;;  %v2056_v53 = vcombine.low %v1490_v27, %v1491_v28 }
 0x1d8   : > { %v2534_v61 = vpack.c.bf16 %v710_v56, %v709_v47  ;;  %1328 = vmatpush1.bf16.msra.mxu0 %v2032_v50  ;;  %1579 = vmatpush1.bf16.msra.mxu1 %v2048_v51  ;;  %v2059_v56 = vcombine.high %v1492_v45, %v1493_v46 }
 0x1d9   : > { %v2536_v62 = vpack.c.bf16 %v708_v57, %v707_v52  ;;  %v2123_v63 = vpop.f32.mrb[8].mxu1  ;;  %1329 = vmatprep.subr.bf16.mxu0 %v2035_v54  ;;  %1580 = vmatprep.subr.bf16.mxu1 %v2051_v55  ;;  %v2040_v52 = vcombine.low %v1239_v24, %v1240_v26  ;;  %v2043_v55 = vcombine.high %v1241_v40, %v1242_v44 }
 0x1da   : > { %v681_v2 = vadd.f32 %v2123_v63, %v2480_v17  ;;  %v672_v3 = vpop.f32.mrb[9].mxu1 }
 0x1db   : > { %866 = vmatmul.mubr.bf16.gmra.mrb[20].mxu0 %v2498_v33  ;;  %1117 = vmatmul.mubr.bf16.gmra.mrb[20].mxu1 %v2498_v33  ;;  %v673_v8 = vadd.f32 %v2480_v17, %v672_v3  ;;  %v2124_v9 = vpop.f32.mrb[10].mxu1 }
 0x1dc   : > { %v713_v13 = vmax.f32 %v681_v2, 0.0  ;;  %875 = vmatprep.mubr.bf16.mxu0 %v2225_v7  ;;  %1126 = vmatprep.mubr.bf16.mxu1 %v2225_v7  ;;  %v684_v14 = vadd.f32 %v2124_v9, %v2480_v17  ;;  %v675_v15 = vpop.f32.mrb[11].mxu1  ;;  %v2045_v2 = vcombine.high %v1243_v42, %v1244_v58 }
 0x1dd   : > { %v711_v18 = vmax.f32 %v673_v8, 0.0  ;;  %1330 = vmatpush1.bf16.msra.mxu0 %v2034_v0  ;;  %1581 = vmatpush1.bf16.msra.mxu1 %v2050_v1  ;;  %v676_v16 = vadd.f32 %v2480_v17, %v675_v15  ;;  %v2042_v0 = vcombine.low %v1241_v40, %v1242_v44  ;;  %v2058_v1 = vcombine.low %v1492_v45, %v1493_v46 }
 0x1de   : > { %v714_v21 = vmax.f32 %v684_v14, 0.0  ;;  %1331 = vmatprep.subr.bf16.mxu0 %v2037_v4  ;;  %1582 = vmatprep.subr.bf16.mxu1 %v2053_v5  ;;  %v2044_v4 = vcombine.low %v1243_v42, %v1244_v58 }
 0x1df   : > { %v712_v25 = vmax.f32 %v676_v16, 0.0 }
 0x1e0   : > { %v2570_v29 = vpack.c.bf16 %v714_v21, %v713_v13 }
 0x1e1   : > { %v2572_v30 = vpack.c.bf16 %v712_v25, %v711_v18  ;;  %1332 = vmatpush1.bf16.msra.mxu0 %v2036_v19  ;;  %1583 = vmatpush1.bf16.msra.mxu1 %v2052_v20  ;;  %v2127_v31 = vpop.f32.mrb[12].mxu1 }
 0x1e2   : > { %v697_v36 = vadd.f32 %v2127_v31, %v2480_v17  ;;  %1333 = vmatprep.subr.bf16.mxu0 %v2039_v22  ;;  %1584 = vmatprep.subr.bf16.mxu1 %v2055_v23  ;;  %v688_v37 = vpop.f32.mrb[13].mxu1 }
 0x1e3   : > { %876 = vmatmul.mubr.bf16.gmra.mrb[24].mxu0 %v2536_v62  ;;  %1127 = vmatmul.mubr.bf16.gmra.mrb[24].mxu1 %v2536_v62  ;;  %v689_v41 = vadd.f32 %v2480_v17, %v688_v37  ;;  %v2128_v43 = vpop.f32.mrb[14].mxu1 }
 0x1e4   : > { %885 = vmatprep.mubr.bf16.mxu0 %v2225_v7  ;;  %1136 = vmatprep.mubr.bf16.mxu1 %v2225_v7  ;;  %v717_v47 = vmax.f32 %v697_v36, 0.0  ;;  %v700_v48 = vadd.f32 %v2128_v43, %v2480_v17  ;;  %v691_v49 = vpop.f32.mrb[15].mxu1 }
 0x1e5   : > { %v715_v50 = vmax.f32 %v689_v41, 0.0  ;;  %1334 = vmatpush1.bf16.msra.mxu0 %v2038_v32  ;;  %1585 = vmatpush1.bf16.msra.mxu1 %v2054_v35  ;;  %v692_v51 = vadd.f32 %v2480_v17, %v691_v49  ;;  %v1494_v17 = vld [vmem:[%s2693_s3 + $0x1d8] sm:$0xff] }
 0x1e6   : > { %v718_v54 = vmax.f32 %v700_v48, 0.0  ;;  %1335 = vmatprep.subr.bf16.mxu0 %v2041_v38  ;;  %1586 = vmatprep.subr.bf16.mxu1 %v2057_v39  ;;  %v2061_v3 = vcombine.high %v1494_v17, %v1495_v59  ;;  %v2060_v5 = vcombine.low %v1494_v17, %v1495_v59 }
 0x1e7   : > { %v716_v57 = vmax.f32 %v692_v51, 0.0 }
 0x1e8   : > { %v2606_v60 = vpack.c.bf16 %v718_v54, %v717_v47 }
 0x1e9   : > { %v725_v63 = vpack.c.bf16 %v716_v57, %v715_v50  ;;  %1336 = vmatpush1.bf16.msra.mxu0 %v2040_v52  ;;  %1587 = vmatpush1.bf16.msra.mxu1 %v2056_v53 }
 0x1ea   : > { %1337 = vmatprep.subr.bf16.mxu0 %v2043_v55  ;;  %1588 = vmatprep.subr.bf16.mxu1 %v2059_v56 }
 0x1eb   : > { %886 = vmatmul.mubr.bf16.gmra.mrb[28].mxu0 %v2534_v61  ;;  %1137 = vmatmul.mubr.bf16.gmra.mrb[28].mxu1 %v2534_v61 }
 0x1ec   : > { %895 = vmatprep.mubr.bf16.mxu0 %v2225_v7  ;;  %1146 = vmatprep.mubr.bf16.mxu1 %v2225_v7 }
 0x1ed   : > { %1338 = vmatpush1.bf16.msra.mxu0 %v2042_v0  ;;  %1589 = vmatpush1.bf16.msra.mxu1 %v2058_v1 }
 0x1ee   : > { %1339 = vmatprep.subr.bf16.mxu0 %v2045_v2  ;;  %1590 = vmatprep.subr.bf16.mxu1 %v2061_v3 }
 0x1f1   : > { %1340 = vmatpush1.bf16.msra.mxu0 %v2044_v4  ;;  %1591 = vmatpush1.bf16.msra.mxu1 %v2060_v5 }
 0x1f3   : > { %896 = vmatmul.mubr.bf16.gmra.mrb[32].mxu0 %v2572_v30  ;;  %1147 = vmatmul.mubr.bf16.gmra.mrb[32].mxu1 %v2572_v30 }
 0x1f4   : > { %905 = vmatprep.mubr.bf16.mxu0 %v2225_v7  ;;  %1156 = vmatprep.mubr.bf16.mxu1 %v2225_v7 }
 0x1fb   : > { %906 = vmatmul.mubr.bf16.gmra.mrb[36].mxu0 %v2570_v29  ;;  %1157 = vmatmul.mubr.bf16.gmra.mrb[36].mxu1 %v2570_v29 }
 0x1fc   : > { %915 = vmatprep.mubr.bf16.mxu0 %v2225_v7  ;;  %1166 = vmatprep.mubr.bf16.mxu1 %v2225_v7 }
 0x203   : > { %916 = vmatmul.mubr.bf16.gmra.mrb[40].mxu0 %v725_v63  ;;  %1167 = vmatmul.mubr.bf16.gmra.mrb[40].mxu1 %v725_v63 }
 0x204   : > { %925 = vmatprep.mubr.bf16.mxu0 %v2225_v7  ;;  %1176 = vmatprep.mubr.bf16.mxu1 %v2225_v7 }
 0x20b   : > { %926 = vmatmul.mubr.bf16.gmra.mrb[44].mxu0 %v2606_v60  ;;  %1177 = vmatmul.mubr.bf16.gmra.mrb[44].mxu1 %v2606_v60 }
 0x20c   : > { %1357 = vmatprep.mubr.bf16.mxu0 %v2225_v7  ;;  %1608 = vmatprep.mubr.bf16.mxu1 %v2225_v7 }
 0x213   : > { %1358 = vmatmul.mubr.bf16.vlgmr.msra.gmra.mrb[48].mxu0 %v2500_v34  ;;  %1609 = vmatmul.mubr.bf16.vlgmr.msra.gmra.mrb[48].mxu1 %v2500_v34 }
 0x214   : > { %1367 = vmatprep.mubr.bf16.mxu0 %v2225_v7  ;;  %1618 = vmatprep.mubr.bf16.mxu1 %v2225_v7 }
 0x21b   : > { %1368 = vmatmul.mubr.bf16.gmra.mrb[52].mxu0 %v2498_v33  ;;  %1619 = vmatmul.mubr.bf16.gmra.mrb[52].mxu1 %v2498_v33 }
 0x21c   : > { %1377 = vmatprep.mubr.bf16.mxu0 %v2225_v7  ;;  %1628 = vmatprep.mubr.bf16.mxu1 %v2225_v7 }
 0x223   : > { %1378 = vmatmul.mubr.bf16.gmra.mrb[56].mxu0 %v2536_v62  ;;  %1629 = vmatmul.mubr.bf16.gmra.mrb[56].mxu1 %v2536_v62 }
 0x224   : > { %1387 = vmatprep.mubr.bf16.mxu0 %v2225_v7  ;;  %1638 = vmatprep.mubr.bf16.mxu1 %v2225_v7 }
 0x22b   : > { %1388 = vmatmul.mubr.bf16.gmra.mrb[60].mxu0 %v2534_v61  ;;  %1639 = vmatmul.mubr.bf16.gmra.mrb[60].mxu1 %v2534_v61 }
 0x22c   : > { %1397 = vmatprep.mubr.bf16.mxu0 %v2225_v7  ;;  %1648 = vmatprep.mubr.bf16.mxu1 %v2225_v7 }
 0x233   : > { %1398 = vmatmul.mubr.bf16.gmra.mrb[64].mxu0 %v2572_v30  ;;  %1649 = vmatmul.mubr.bf16.gmra.mrb[64].mxu1 %v2572_v30 }
 0x234   : > { %1407 = vmatprep.mubr.bf16.mxu0 %v2225_v7  ;;  %1658 = vmatprep.mubr.bf16.mxu1 %v2225_v7 }
 0x23b   : > { %1408 = vmatmul.mubr.bf16.gmra.mrb[68].mxu0 %v2570_v29  ;;  %1659 = vmatmul.mubr.bf16.gmra.mrb[68].mxu1 %v2570_v29 }
 0x23c   : > { %1417 = vmatprep.mubr.bf16.mxu0 %v2225_v7  ;;  %1668 = vmatprep.mubr.bf16.mxu1 %v2225_v7 }
 0x243   : > { %1418 = vmatmul.mubr.bf16.gmra.mrb[72].mxu0 %v725_v63  ;;  %1669 = vmatmul.mubr.bf16.gmra.mrb[72].mxu1 %v725_v63 }
 0x244   : > { %1427 = vmatprep.mubr.bf16.mxu0 %v2225_v7  ;;  %1678 = vmatprep.mubr.bf16.mxu1 %v2225_v7 }
 0x24b   : > { %1428 = vmatmul.mubr.bf16.gmra.mrb[76].mxu0 %v2606_v60  ;;  %1679 = vmatmul.mubr.bf16.gmra.mrb[76].mxu1 %v2606_v60 }
 0x2a6   : > { %v857_v33 = vpop.f32.mrb[16].mxu0  ;;  %v1108_v34 = vpop.f32.mrb[16].mxu1 }
 0x2a7   : > { %v859_v61 = vpop.f32.mrb[17].mxu0  ;;  %v1110_v62 = vpop.f32.mrb[17].mxu1 }
 0x2a8   : > { %v861_v6 = vpop.f32.mrb[18].mxu0  ;;  %v1112_v8 = vpop.f32.mrb[18].mxu1 }
 0x2a9   : > { %v863_v9 = vpop.f32.mrb[19].mxu0  ;;  %v1114_v10 = vpop.f32.mrb[19].mxu1 }
 0x2ae   : > { %v867_v11 = vpop.f32.mrb[20].mxu0  ;;  %v1118_v12 = vpop.f32.mrb[20].mxu1 }
 0x2af   : > { %v936_v13 = vmax.f32 %v857_v33, %v867_v11  ;;  %v1187_v14 = vmax.f32 %v1108_v34, %v1118_v12  ;;  %v869_v15 = vpop.f32.mrb[21].mxu0  ;;  %v1120_v18 = vpop.f32.mrb[21].mxu1 }
 0x2b0   : > { %v957_v16 = vmax.f32 %v859_v61, %v869_v15  ;;  %v1208_v7 = vmax.f32 %v1110_v62, %v1120_v18  ;;  %v871_v19 = vpop.f32.mrb[22].mxu0  ;;  %v1122_v20 = vpop.f32.mrb[22].mxu1 }
 0x2b1   : > { %v937_v21 = vmax.f32 %v861_v6, %v871_v19  ;;  %v1188_v22 = vmax.f32 %v1112_v8, %v1122_v20  ;;  %v873_v23 = vpop.f32.mrb[23].mxu0  ;;  %v1124_v24 = vpop.f32.mrb[23].mxu1 }
 0x2b2   : > { %v958_v25 = vmax.f32 %v863_v9, %v873_v23  ;;  %v1209_v26 = vmax.f32 %v1114_v10, %v1124_v24 }
 0x2b6   : > { %v877_v27 = vpop.f32.mrb[24].mxu0  ;;  %v1128_v28 = vpop.f32.mrb[24].mxu1 }
 0x2b7   : > { %v938_v29 = vmax.f32 %v936_v13, %v877_v27  ;;  %v1189_v30 = vmax.f32 %v1187_v14, %v1128_v28  ;;  %v879_v31 = vpop.f32.mrb[25].mxu0  ;;  %v1130_v32 = vpop.f32.mrb[25].mxu1 }
 0x2b8   : > { %v959_v35 = vmax.f32 %v957_v16, %v879_v31  ;;  %v1210_v36 = vmax.f32 %v1208_v7, %v1130_v32  ;;  %v881_v37 = vpop.f32.mrb[26].mxu0  ;;  %v1132_v38 = vpop.f32.mrb[26].mxu1 }
 0x2b9   : > { %v939_v39 = vmax.f32 %v937_v21, %v881_v37  ;;  %v1190_v40 = vmax.f32 %v1188_v22, %v1132_v38  ;;  %v883_v41 = vpop.f32.mrb[27].mxu0  ;;  %v1134_v43 = vpop.f32.mrb[27].mxu1 }
 0x2ba   : > { %v960_v44 = vmax.f32 %v958_v25, %v883_v41  ;;  %v1211_v45 = vmax.f32 %v1209_v26, %v1134_v43 }
 0x2be   : > { %v887_v46 = vpop.f32.mrb[28].mxu0  ;;  %v1138_v47 = vpop.f32.mrb[28].mxu1 }
 0x2bf   : > { %v940_v48 = vmax.f32 %v938_v29, %v887_v46  ;;  %v1191_v49 = vmax.f32 %v1189_v30, %v1138_v47  ;;  %v889_v50 = vpop.f32.mrb[29].mxu0  ;;  %v1140_v51 = vpop.f32.mrb[29].mxu1 }
 0x2c0   : > { %v961_v52 = vmax.f32 %v959_v35, %v889_v50  ;;  %v1212_v53 = vmax.f32 %v1210_v36, %v1140_v51  ;;  %v891_v54 = vpop.f32.mrb[30].mxu0  ;;  %v1142_v55 = vpop.f32.mrb[30].mxu1 }
 0x2c1   : > { %v941_v56 = vmax.f32 %v939_v39, %v891_v54  ;;  %v1192_v42 = vmax.f32 %v1190_v40, %v1142_v55  ;;  %v893_v57 = vpop.f32.mrb[31].mxu0  ;;  %v1144_v58 = vpop.f32.mrb[31].mxu1 }
 0x2c2   : > { %v962_v17 = vmax.f32 %v960_v44, %v893_v57  ;;  %v1213_v59 = vmax.f32 %v1211_v45, %v1144_v58 }
 0x2c6   : > { %v897_v60 = vpop.f32.mrb[32].mxu0  ;;  %v1148_v63 = vpop.f32.mrb[32].mxu1 }
 0x2c7   : > { %v942_v0 = vmax.f32 %v940_v48, %v897_v60  ;;  %v1193_v1 = vmax.f32 %v1191_v49, %v1148_v63  ;;  %v899_v2 = vpop.f32.mrb[33].mxu0  ;;  %v1150_v3 = vpop.f32.mrb[33].mxu1 }
 0x2c8   : > { %v963_v4 = vmax.f32 %v961_v52, %v899_v2  ;;  %v1214_v5 = vmax.f32 %v1212_v53, %v1150_v3  ;;  %v901_v33 = vpop.f32.mrb[34].mxu0  ;;  %v1152_v34 = vpop.f32.mrb[34].mxu1 }
 0x2c9   : > { %v943_v61 = vmax.f32 %v941_v56, %v901_v33  ;;  %v1194_v62 = vmax.f32 %v1192_v42, %v1152_v34  ;;  %v903_v6 = vpop.f32.mrb[35].mxu0  ;;  %v1154_v8 = vpop.f32.mrb[35].mxu1 }
 0x2ca   : > { %v964_v9 = vmax.f32 %v962_v17, %v903_v6  ;;  %v1215_v10 = vmax.f32 %v1213_v59, %v1154_v8 }
 0x2ce   : > { %v907_v11 = vpop.f32.mrb[36].mxu0  ;;  %v1158_v12 = vpop.f32.mrb[36].mxu1 }
 0x2cf   : > { %v944_v13 = vmax.f32 %v942_v0, %v907_v11  ;;  %v1195_v14 = vmax.f32 %v1193_v1, %v1158_v12  ;;  %v909_v15 = vpop.f32.mrb[37].mxu0  ;;  %v1160_v18 = vpop.f32.mrb[37].mxu1 }
 0x2d0   : > { %v965_v16 = vmax.f32 %v963_v4, %v909_v15  ;;  %v1216_v7 = vmax.f32 %v1214_v5, %v1160_v18  ;;  %v911_v19 = vpop.f32.mrb[38].mxu0  ;;  %v1162_v20 = vpop.f32.mrb[38].mxu1 }
 0x2d1   : > { %v945_v21 = vmax.f32 %v943_v61, %v911_v19  ;;  %v1196_v22 = vmax.f32 %v1194_v62, %v1162_v20  ;;  %v913_v23 = vpop.f32.mrb[39].mxu0  ;;  %v1164_v24 = vpop.f32.mrb[39].mxu1 }
 0x2d2   : > { %v966_v25 = vmax.f32 %v964_v9, %v913_v23  ;;  %v1217_v26 = vmax.f32 %v1215_v10, %v1164_v24 }
 0x2d6   : > { %v917_v27 = vpop.f32.mrb[40].mxu0  ;;  %v1168_v28 = vpop.f32.mrb[40].mxu1 }
 0x2d7   : > { %v946_v29 = vmax.f32 %v944_v13, %v917_v27  ;;  %v1197_v30 = vmax.f32 %v1195_v14, %v1168_v28  ;;  %v919_v31 = vpop.f32.mrb[41].mxu0  ;;  %v1170_v32 = vpop.f32.mrb[41].mxu1 }
 0x2d8   : > { %v967_v35 = vmax.f32 %v965_v16, %v919_v31  ;;  %v1218_v36 = vmax.f32 %v1216_v7, %v1170_v32  ;;  %v921_v37 = vpop.f32.mrb[42].mxu0  ;;  %v1172_v38 = vpop.f32.mrb[42].mxu1 }
 0x2d9   : > { %v947_v39 = vmax.f32 %v945_v21, %v921_v37  ;;  %v1198_v40 = vmax.f32 %v1196_v22, %v1172_v38  ;;  %v923_v41 = vpop.f32.mrb[43].mxu0  ;;  %v1174_v43 = vpop.f32.mrb[43].mxu1 }
 0x2da   : > { %v968_v44 = vmax.f32 %v966_v25, %v923_v41  ;;  %v1219_v45 = vmax.f32 %v1217_v26, %v1174_v43 }
 0x2de   : > { %v927_v46 = vpop.f32.mrb[44].mxu0  ;;  %v1178_v47 = vpop.f32.mrb[44].mxu1 }
 0x2df   : > { %v948_v48 = vmax.f32 %v946_v29, %v927_v46  ;;  %v1199_v49 = vmax.f32 %v1197_v30, %v1178_v47  ;;  %v929_v50 = vpop.f32.mrb[45].mxu0  ;;  %v1180_v51 = vpop.f32.mrb[45].mxu1 }
 0x2e0   : > { %v969_v52 = vmax.f32 %v967_v35, %v929_v50  ;;  %v1220_v53 = vmax.f32 %v1218_v36, %v1180_v51  ;;  %v931_v54 = vpop.f32.mrb[46].mxu0  ;;  %v1182_v55 = vpop.f32.mrb[46].mxu1 }
 0x2e1   : > { %v949_v56 = vmax.f32 %v947_v39, %v931_v54  ;;  %v1200_v42 = vmax.f32 %v1198_v40, %v1182_v55  ;;  %v933_v57 = vpop.f32.mrb[47].mxu0  ;;  %v1184_v58 = vpop.f32.mrb[47].mxu1 }
 0x2e2   : > { %v970_v17 = vmax.f32 %v968_v44, %v933_v57  ;;  %v1221_v59 = vmax.f32 %v1219_v45, %v1184_v58 }
 0x2e3   : > { %v950_v60 = vmax.f32 %v948_v48, %v949_v56  ;;  %v1201_v63 = vmax.f32 %v1199_v49, %v1200_v42 }
 0x2e4   : > { %v971_v0 = vmax.f32 %v969_v52, %v970_v17  ;;  %v1222_v1 = vmax.f32 %v1220_v53, %v1221_v59 }
 0x2e5   : > { %v951_v2 = vrot.slane %v950_v60, 4  ;;  %v1202_v3 = vrot.slane %v1201_v63, 4 }
 0x2e6   : > { %v972_v4 = vrot.slane %v971_v0, 4  ;;  %v1223_v5 = vrot.slane %v1222_v1, 4  ;;  %v1359_v33 = vpop.f32.mrb[48].mxu0  ;;  %v1610_v34 = vpop.f32.mrb[48].mxu1 }
 0x2e7   : > { %v952_v61 = vmax.f32 %v950_v60, %v951_v2  ;;  %v1203_v62 = vmax.f32 %v1201_v63, %v1202_v3  ;;  %v1361_v6 = vpop.f32.mrb[49].mxu0  ;;  %v1612_v8 = vpop.f32.mrb[49].mxu1 }
 0x2e8   : > { %v973_v9 = vmax.f32 %v971_v0, %v972_v4  ;;  %v1224_v10 = vmax.f32 %v1222_v1, %v1223_v5  ;;  %v1363_v11 = vpop.f32.mrb[50].mxu0  ;;  %v1614_v12 = vpop.f32.mrb[50].mxu1 }
 0x2e9   : > { %v953_v13 = vrot.slane %v952_v61, 2  ;;  %v1204_v14 = vrot.slane %v1203_v62, 2  ;;  %v1365_v15 = vpop.f32.mrb[51].mxu0  ;;  %v1616_v18 = vpop.f32.mrb[51].mxu1 }
 0x2ea   : > { %v974_v16 = vrot.slane %v973_v9, 2  ;;  %v1225_v7 = vrot.slane %v1224_v10, 2 }
 0x2eb   : > { %v954_v19 = vmax.f32 %v952_v61, %v953_v13  ;;  %v1205_v20 = vmax.f32 %v1203_v62, %v1204_v14 }
 0x2ec   : > { %v975_v21 = vmax.f32 %v973_v9, %v974_v16  ;;  %v1226_v22 = vmax.f32 %v1224_v10, %v1225_v7 }
 0x2ed   : > { %v955_v23 = vrot.slane %v954_v19, 1  ;;  %v1206_v24 = vrot.slane %v1205_v20, 1 }
 0x2ee   : > { %v976_v25 = vrot.slane %v975_v21, 1  ;;  %v1227_v26 = vrot.slane %v1226_v22, 1  ;;  %v1369_v27 = vpop.f32.mrb[52].mxu0  ;;  %v1620_v28 = vpop.f32.mrb[52].mxu1 }
 0x2ef   : > { %v2654_v29 = vmax.f32 %v954_v19, %v955_v23  ;;  %v2656_v30 = vmax.f32 %v1205_v20, %v1206_v24  ;;  %v1438_v31 = vmax.f32 %v1359_v33, %v1369_v27  ;;  %v1689_v32 = vmax.f32 %v1610_v34, %v1620_v28  ;;  %v1371_v35 = vpop.f32.mrb[53].mxu0  ;;  %v1622_v36 = vpop.f32.mrb[53].mxu1 }
 0x2f0   : > { %v2658_v37 = vmax.f32 %v975_v21, %v976_v25  ;;  %v2660_v38 = vmax.f32 %v1226_v22, %v1227_v26  ;;  %v1459_v39 = vmax.f32 %v1361_v6, %v1371_v35  ;;  %v1710_v40 = vmax.f32 %v1612_v8, %v1622_v36  ;;  %v1373_v41 = vpop.f32.mrb[54].mxu0  ;;  %v1624_v43 = vpop.f32.mrb[54].mxu1 }
 0x2f1   : > { %v1439_v44 = vmax.f32 %v1363_v11, %v1373_v41  ;;  %v1690_v45 = vmax.f32 %v1614_v12, %v1624_v43  ;;  %v1375_v46 = vpop.f32.mrb[55].mxu0  ;;  %v1626_v47 = vpop.f32.mrb[55].mxu1 }
 0x2f2   : > { %v1460_v48 = vmax.f32 %v1365_v15, %v1375_v46  ;;  %v1711_v49 = vmax.f32 %v1616_v18, %v1626_v47 }
 0x2f6   : > { %v1379_v50 = vpop.f32.mrb[56].mxu0  ;;  %v1630_v51 = vpop.f32.mrb[56].mxu1 }
 0x2f7   : > { %v1440_v52 = vmax.f32 %v1438_v31, %v1379_v50  ;;  %v1691_v53 = vmax.f32 %v1689_v32, %v1630_v51  ;;  %v1381_v54 = vpop.f32.mrb[57].mxu0  ;;  %v1632_v55 = vpop.f32.mrb[57].mxu1 }
 0x2f8   : > { %v1461_v56 = vmax.f32 %v1459_v39, %v1381_v54  ;;  %v1712_v42 = vmax.f32 %v1710_v40, %v1632_v55  ;;  %v1383_v57 = vpop.f32.mrb[58].mxu0  ;;  %v1634_v58 = vpop.f32.mrb[58].mxu1 }
 0x2f9   : > { %v1441_v17 = vmax.f32 %v1439_v44, %v1383_v57  ;;  %v1692_v59 = vmax.f32 %v1690_v45, %v1634_v58  ;;  %v1385_v60 = vpop.f32.mrb[59].mxu0  ;;  %v1636_v63 = vpop.f32.mrb[59].mxu1 }
 0x2fa   : > { %v1462_v0 = vmax.f32 %v1460_v48, %v1385_v60  ;;  %v1713_v1 = vmax.f32 %v1711_v49, %v1636_v63 }
 0x2fe   : > { %v1389_v2 = vpop.f32.mrb[60].mxu0  ;;  %v1640_v3 = vpop.f32.mrb[60].mxu1 }
 0x2ff   : > { %v1442_v4 = vmax.f32 %v1440_v52, %v1389_v2  ;;  %v1693_v5 = vmax.f32 %v1691_v53, %v1640_v3  ;;  %v1391_v33 = vpop.f32.mrb[61].mxu0  ;;  %v1642_v34 = vpop.f32.mrb[61].mxu1 }
 0x300   : > { %v1463_v61 = vmax.f32 %v1461_v56, %v1391_v33  ;;  %v1714_v62 = vmax.f32 %v1712_v42, %v1642_v34  ;;  %v1393_v6 = vpop.f32.mrb[62].mxu0  ;;  %v1644_v8 = vpop.f32.mrb[62].mxu1 }
 0x301   : > { %v1443_v9 = vmax.f32 %v1441_v17, %v1393_v6  ;;  %v1694_v10 = vmax.f32 %v1692_v59, %v1644_v8  ;;  %v1395_v11 = vpop.f32.mrb[63].mxu0  ;;  %v1646_v12 = vpop.f32.mrb[63].mxu1 }
 0x302   : > { %v1464_v13 = vmax.f32 %v1462_v0, %v1395_v11  ;;  %v1715_v14 = vmax.f32 %v1713_v1, %v1646_v12 }
 0x306   : > { %v1399_v15 = vpop.f32.mrb[64].mxu0  ;;  %v1650_v18 = vpop.f32.mrb[64].mxu1 }
 0x307   : > { %v1444_v16 = vmax.f32 %v1442_v4, %v1399_v15  ;;  %v1695_v7 = vmax.f32 %v1693_v5, %v1650_v18  ;;  %v1401_v19 = vpop.f32.mrb[65].mxu0  ;;  %v1652_v20 = vpop.f32.mrb[65].mxu1 }
 0x308   : > { %v1465_v21 = vmax.f32 %v1463_v61, %v1401_v19  ;;  %v1716_v22 = vmax.f32 %v1714_v62, %v1652_v20  ;;  %v1403_v23 = vpop.f32.mrb[66].mxu0  ;;  %v1654_v24 = vpop.f32.mrb[66].mxu1 }
 0x309   : > { %v1445_v25 = vmax.f32 %v1443_v9, %v1403_v23  ;;  %v1696_v26 = vmax.f32 %v1694_v10, %v1654_v24  ;;  %v1405_v27 = vpop.f32.mrb[67].mxu0  ;;  %v1656_v28 = vpop.f32.mrb[67].mxu1 }
 0x30a   : > { %v1466_v31 = vmax.f32 %v1464_v13, %v1405_v27  ;;  %v1717_v32 = vmax.f32 %v1715_v14, %v1656_v28 }
 0x30e   : > { %v1409_v35 = vpop.f32.mrb[68].mxu0  ;;  %v1660_v36 = vpop.f32.mrb[68].mxu1 }
 0x30f   : > { %v1446_v39 = vmax.f32 %v1444_v16, %v1409_v35  ;;  %v1697_v40 = vmax.f32 %v1695_v7, %v1660_v36  ;;  %v1411_v41 = vpop.f32.mrb[69].mxu0  ;;  %v1662_v43 = vpop.f32.mrb[69].mxu1 }
 0x310   : > { %v1467_v44 = vmax.f32 %v1465_v21, %v1411_v41  ;;  %v1718_v45 = vmax.f32 %v1716_v22, %v1662_v43  ;;  %v1413_v46 = vpop.f32.mrb[70].mxu0  ;;  %v1664_v47 = vpop.f32.mrb[70].mxu1 }
 0x311   : > { %v1447_v48 = vmax.f32 %v1445_v25, %v1413_v46  ;;  %v1698_v49 = vmax.f32 %v1696_v26, %v1664_v47  ;;  %v1415_v50 = vpop.f32.mrb[71].mxu0  ;;  %v1666_v51 = vpop.f32.mrb[71].mxu1 }
 0x312   : > { %v1468_v52 = vmax.f32 %v1466_v31, %v1415_v50  ;;  %v1719_v53 = vmax.f32 %v1717_v32, %v1666_v51 }
 0x316   : > { %v1419_v54 = vpop.f32.mrb[72].mxu0  ;;  %v1670_v55 = vpop.f32.mrb[72].mxu1 }
 0x317   : > { %v1448_v56 = vmax.f32 %v1446_v39, %v1419_v54  ;;  %v1699_v42 = vmax.f32 %v1697_v40, %v1670_v55  ;;  %v1421_v57 = vpop.f32.mrb[73].mxu0  ;;  %v1672_v58 = vpop.f32.mrb[73].mxu1  ;;  %v1750_v54 = vlaneseq (!%p2062_p7)  ;;  %v2226_v55 = vmov (!%p2062_p7), 1966171168  }
 0x318   : > { %v1469_v17 = vmax.f32 %v1467_v44, %v1421_v57  ;;  %v1720_v59 = vmax.f32 %v1718_v45, %v1672_v58  ;;  %v1423_v60 = vpop.f32.mrb[74].mxu0  ;;  %v1674_v63 = vpop.f32.mrb[74].mxu1  ;;  %v1744_v58 = vcombine.low (!%p2062_p7), %v2656_v30, %v2660_v38 }
 0x319   : > { %v1449_v0 = vmax.f32 %v1447_v48, %v1423_v60  ;;  %v1700_v1 = vmax.f32 %v1698_v49, %v1674_v63  ;;  %v1425_v2 = vpop.f32.mrb[75].mxu0  ;;  %v1676_v3 = vpop.f32.mrb[75].mxu1  ;;  %v1751_v57 = vshrl.u32 (!%p2062_p7), %v1750_v54, 7 }
 0x31a   : > { %v1470_v4 = vmax.f32 %v1468_v52, %v1425_v2  ;;  %v1721_v5 = vmax.f32 %v1719_v53, %v1676_v3 }
 0x31e   : > { %v1429_v33 = vpop.f32.mrb[76].mxu0  ;;  %v1680_v34 = vpop.f32.mrb[76].mxu1 }
 0x31f   : > { %v1450_v61 = vmax.f32 %v1448_v56, %v1429_v33  ;;  %v1701_v62 = vmax.f32 %v1699_v42, %v1680_v34  ;;  %v1431_v6 = vpop.f32.mrb[77].mxu0  ;;  %v1682_v8 = vpop.f32.mrb[77].mxu1  ;;  %v1748_v56 = vunpack.c.l.s4 (!%p2062_p7), %v2226_v55  ;;  %v1743_v42 = vcombine.low (!%p2062_p7), %v2654_v29, %v2658_v37 }
 0x320   : > { %v1471_v9 = vmax.f32 %v1469_v17, %v1431_v6  ;;  %v1722_v10 = vmax.f32 %v1720_v59, %v1682_v8  ;;  %v1433_v11 = vpop.f32.mrb[78].mxu0  ;;  %v1684_v12 = vpop.f32.mrb[78].mxu1 }
 0x321   : > { %v1451_v13 = vmax.f32 %v1449_v0, %v1433_v11  ;;  %v1702_v14 = vmax.f32 %v1700_v1, %v1684_v12  ;;  %v1435_v15 = vpop.f32.mrb[79].mxu0  ;;  %v1686_v18 = vpop.f32.mrb[79].mxu1  ;;  %v1749_v60 = vunpack.c.0.s8 (!%p2062_p7), %v1748_v56 }
 0x322   : > { %v1472_v16 = vmax.f32 %v1470_v4, %v1435_v15  ;;  %v1723_v7 = vmax.f32 %v1721_v5, %v1686_v18 }
 0x323   : > { %v1452_v19 = vmax.f32 %v1450_v61, %v1451_v13  ;;  %v1703_v20 = vmax.f32 %v1701_v62, %v1702_v14  ;;  %v1752_v63 = vsub.s32 (!%p2062_p7), %v1749_v60, %v1751_v57 }
 0x324   : > { %v1473_v21 = vmax.f32 %v1471_v9, %v1472_v16  ;;  %v1724_v22 = vmax.f32 %v1722_v10, %v1723_v7 }
 0x325   : > { %v1453_v23 = vrot.slane %v1452_v19, 4  ;;  %v1704_v24 = vrot.slane %v1703_v20, 4  ;;  %v1753_v0 = vrot.slane (!%p2062_p7), %v1743_v42, %v1752_v63  ;;  %v1760_v1 = vrot.slane (!%p2062_p7), %v1744_v58, %v1752_v63 }
 0x326   : > { %v1474_v25 = vrot.slane %v1473_v21, 4  ;;  %v1725_v26 = vrot.slane %v1724_v22, 4 }
 0x327   : > { %v1454_v27 = vmax.f32 %v1452_v19, %v1453_v23  ;;  %v1705_v28 = vmax.f32 %v1703_v20, %v1704_v24  ;;  %v1775_v4 = vcombine.low (!%p2062_p7), %v1753_v0, %v1760_v1 }
 0x328   : > { %v1475_v31 = vmax.f32 %v1473_v21, %v1474_v25  ;;  %v1726_v32 = vmax.f32 %v1724_v22, %v1725_v26 }
 0x329   : > { %v1455_v35 = vrot.slane %v1454_v27, 2  ;;  %v1706_v36 = vrot.slane %v1705_v28, 2  ;;  %v1783_v33 = vrot.slane (!%p2062_p7), %v1775_v4, %v1752_v63 }
 0x32a   : > { %v1476_v39 = vrot.slane %v1475_v31, 2  ;;  %v1727_v40 = vrot.slane %v1726_v32, 2  ;;  %1734 = sbr.rel (%p2062_p7) target bundleno = 829 (0x33d), region = 48 }
 0x32b   : > { %v1456_v41 = vmax.f32 %v1454_v27, %v1455_v35  ;;  %v1707_v43 = vmax.f32 %v1705_v28, %v1706_v36 }
 0x32c   : > { %v1477_v44 = vmax.f32 %v1475_v31, %v1476_v39  ;;  %v1728_v45 = vmax.f32 %v1726_v32, %v1727_v40 }
 0x32d   : > { %v1457_v46 = vrot.slane %v1456_v41, 1  ;;  %v1708_v47 = vrot.slane %v1707_v43, 1 }
 0x32e   : > { %v1478_v48 = vrot.slane %v1477_v44, 1  ;;  %v1729_v49 = vrot.slane %v1728_v45, 1 }
 0x32f   : > { %v1458_v50 = vmax.f32 %v1456_v41, %v1457_v46  ;;  %v1709_v51 = vmax.f32 %v1707_v43, %v1708_v47 }
 0x330   : > { %v1479_v52 = vmax.f32 %v1477_v44, %v1478_v48  ;;  %v1730_v53 = vmax.f32 %v1728_v45, %v1729_v49 }
 0x332   : > { %v1745_v17 = vcombine.low %v1458_v50, %v1479_v52  ;;  %v1746_v59 = vcombine.low %v1709_v51, %v1730_v53 }
 0x334   : > { %v1767_v2 = vrot.slane %v1745_v17, %v1752_v63  ;;  %v1774_v3 = vrot.slane %v1746_v59, %v1752_v63 }
 0x336   : > { %v1776_v5 = vcombine.low %v1767_v2, %v1774_v3 }
 0x338   : > { %v1790_v34 = vrot.slane %v1776_v5, %v1752_v63 }
 0x33a   : > { %v1791_v61 = vcombine.low %v1783_v33, %v1790_v34 }
 0x33c   : > { %1793 = vst [vmem:[%s2311_s30] sm:$0xff] %v1791_v61 }
 0x33d PF: > { %p2063_p8 = scmp.le.s32.totalorder %s2207_s21, 0 }
 0x33e   : > { %v1814_v62 = vlaneseq (!%p2063_p8)  ;;  %v2227_v6 = vmov (!%p2063_p8), 1966171168   ;;  %v1807_v9 = vcombine.low (!%p2063_p8), %v2654_v29, %v2658_v37  ;;  %v1808_v11 = vcombine.low (!%p2063_p8), %v2656_v30, %v2660_v38 }
 0x33f   : > { %1797 = sbr.rel (%p2063_p8) target bundleno = 848 (0x350), region = 52  ;;  %v1812_v8 = vunpack.c.l.s4 (!%p2063_p8), %v2227_v6  ;;  %v1809_v12 = vcombine.low (!%p2063_p8), %v1458_v50, %v1479_v52  ;;  %v1810_v13 = vcombine.low (!%p2063_p8), %v1709_v51, %v1730_v53 }
 0x340   : > { %v1815_v10 = vshrl.u32 (!%p2063_p8), %v1814_v62, 7 }
 0x341   : > { %v1813_v14 = vunpack.c.0.s8 (!%p2063_p8), %v1812_v8 }
 0x343   : > { %v1816_v15 = vsub.s32 (!%p2063_p8), %v1813_v14, %v1815_v10  ;;  %v1798_v24 = vld [vmem:[%s2311_s30] sm:$0xff] (!%p2063_p8) }
 0x345   : > { %v1817_v18 = vrot.slane (!%p2063_p8), %v1807_v9, %v1816_v15  ;;  %v1824_v16 = vrot.slane (!%p2063_p8), %v1808_v11, %v1816_v15  ;;  %v1831_v7 = vrot.slane (!%p2063_p8), %v1809_v12, %v1816_v15  ;;  %v1838_v19 = vrot.slane (!%p2063_p8), %v1810_v13, %v1816_v15 }
 0x347   : > { %v1839_v20 = vcombine.low %v1817_v18, %v1824_v16  ;;  %v1840_v21 = vcombine.low %v1831_v7, %v1838_v19 }
 0x349   : > { %v1847_v22 = vrot.slane %v1839_v20, %v1816_v15  ;;  %v1854_v23 = vrot.slane %v1840_v21, %v1816_v15 }
 0x34b   : > { %v1855_v25 = vcombine.low %v1847_v22, %v1854_v23 }
 0x34d   : > { %v1857_v29 = vmax.f32 %v1798_v24, %v1855_v25 }
 0x34f   : > { %1858 = vst [vmem:[%s2311_s30] sm:$0xff] %v1857_v29 }
 0x350 PF: > { %s16_s25 = sadd.s32 1, %s2223_s25   ;;  %s2697_s21 = smov %s2215_s23 }
 0x351   : > { %p13_p9 = scmp.ge.s32.totalorder %s16_s25, 6   ;;  %s2698_s22 = smov %s2219_s24 }
 0x352   : > { %s2699_s23 = smov %s2702_s26  ;;  %s2700_s24 = smov %s2706_s27 }
 0x353   :  { %15 = sbr.rel (!%p13_p9) target bundleno = 3 (0x3), region = 85 }

</bundles_post_ra>
